<compile_context>
chip_gen: v5e
topology: v5e:2x2
jax: 0.10.0
libtpu: 0.0.40
codegen_flags: <defaults>
</compile_context>

<pallas_src>
import jax
import jax.numpy as jnp
from jax.experimental import pallas as pl
from jax.experimental.pallas import tpu as pltpu

IN_DIM = 784
HID_DIM = 512
OUT_DIM = 10


def _cdiv(a: int, b: int) -> int:
    return -(-a // b)


def _round_up(x: int, m: int) -> int:
    return _cdiv(x, m) * m


def mlp_kernel(x_ref, w1_ref, b1_ref, w2_ref, b2_ref, o_ref):
    # Layer 1: (TB,784) @ (784,512) on the MXU, f32 accumulate.  Operand dtype
    # (bf16 or f32) flows in from the wrapper.
    h = jnp.dot(x_ref[...], w1_ref[...], preferred_element_type=jnp.float32)
    h = jnp.maximum(h + b1_ref[...], 0.0)            # bias + ReLU in f32 (VPU)
    # Dropout (p=0.2) -> identity in eval mode.
    h = h.astype(w2_ref.dtype)                       # match 2nd matmul operand dtype
    # Projection: (TB,512) @ (512,10) + b2
    logits = jnp.dot(h, w2_ref[...], preferred_element_type=jnp.float32)
    logits = logits + b2_ref[...]
    out = jax.nn.sigmoid(logits)                     # EUP
    # torch.round(out, decimals=4): scale, round-half-to-even, unscale.
    o_ref[...] = jnp.round(out * 1e4) * 1e-4


def solution_forward(images, w1, b1, w2, b2, *, tb: int = 1024,
                     use_bf16: bool = True):
    B = images.shape[0]

    # ---- Adaptive batch-tile selection -------------------------------------
    # At least 2 grid steps for large batches so v7x's two TensorCores both
    # get work; TB chosen so padding waste is < one 8-row sublane granule.
    min_tiles = 2 if B >= 256 else 1
    n_tiles = max(_cdiv(B, tb), min_tiles)
    TB = _round_up(_cdiv(B, n_tiles), 8)
    B_pad = _round_up(B, TB)
    if B_pad != B:
        images = jnp.pad(images, ((0, B_pad - B), (0, 0)))
    grid = (B_pad // TB,)

    # ---- Operand dtype prep (once, outside the kernel) ----------------------
    op_dtype = jnp.bfloat16 if use_bf16 else jnp.float32
    x_in = images.astype(op_dtype)
    w1_in = w1.astype(op_dtype)
    w2_in = w2.astype(op_dtype)
    b1_in = b1.reshape(1, HID_DIM).astype(jnp.float32)
    b2_in = b2.reshape(1, OUT_DIM).astype(jnp.float32)

    itemsize = jnp.dtype(op_dtype).itemsize
    cost = pl.CostEstimate(
        flops=2 * B_pad * (IN_DIM * HID_DIM + HID_DIM * OUT_DIM),
        transcendentals=B_pad * OUT_DIM,
        bytes_accessed=(B_pad * IN_DIM * itemsize
                        + (IN_DIM * HID_DIM + HID_DIM * OUT_DIM) * itemsize
                        + (HID_DIM + OUT_DIM) * 4
                        + B_pad * OUT_DIM * 4),
    )

    out = pl.pallas_call(
        mlp_kernel,
        out_shape=jax.ShapeDtypeStruct((B_pad, OUT_DIM), jnp.float32),
        grid_spec=pltpu.PrefetchScalarGridSpec(
            num_scalar_prefetch=0,
            grid=grid,
            in_specs=[
                # x: streams through the pipeline, one batch tile per step.
                pl.BlockSpec((TB, IN_DIM), lambda i: (i, 0)),
                # Weights / biases: constant index_map -> DMA'd once, resident.
                pl.BlockSpec((IN_DIM, HID_DIM), lambda i: (0, 0)),
                pl.BlockSpec((1, HID_DIM), lambda i: (0, 0)),
                pl.BlockSpec((HID_DIM, OUT_DIM), lambda i: (0, 0)),
                pl.BlockSpec((1, OUT_DIM), lambda i: (0, 0)),
            ],
            out_specs=pl.BlockSpec((TB, OUT_DIM), lambda i: (i, 0)),
        ),
        compiler_params=pltpu.CompilerParams(
            dimension_semantics=("parallel",),
            vmem_limit_bytes=32 * 1024 * 1024,
        ),
        cost_estimate=cost,
    )(x_in, w1_in, b1_in, w2_in, b2_in)

    return out[:B]


def init_params(key):
    """Deterministic synthetic init (PyTorch-Linear-style uniform bounds)."""
    k1, k2, k3, k4 = jax.random.split(key, 4)
    bound1 = 1.0 / jnp.sqrt(float(IN_DIM))
    bound2 = 1.0 / jnp.sqrt(float(HID_DIM))
    w1 = jax.random.uniform(k1, (IN_DIM, HID_DIM), jnp.float32, -bound1, bound1)
    b1 = jax.random.uniform(k2, (HID_DIM,), jnp.float32, -bound1, bound1)
    w2 = jax.random.uniform(k3, (HID_DIM, OUT_DIM), jnp.float32, -bound2, bound2)
    b2 = jax.random.uniform(k4, (OUT_DIM,), jnp.float32, -bound2, bound2)
    return w1, b1, w2, b2


def _ref_forward(x, w1, b1, w2, b2, op_dtype):
    """Pure-JAX reference with the same operand dtype as the kernel."""
    xo = x.astype(op_dtype)
    h = jnp.dot(xo, w1.astype(op_dtype), preferred_element_type=jnp.float32) + b1
    h = jnp.maximum(h, 0.0).astype(op_dtype)
    logits = jnp.dot(h, w2.astype(op_dtype),
                     preferred_element_type=jnp.float32) + b2
    return jnp.round(jax.nn.sigmoid(logits) * 1e4) * 1e-4


if __name__ == "__main__":
    key = jax.random.PRNGKey(0)
    k_x, k_p = jax.random.split(key)

    w1, b1, w2, b2 = init_params(k_p)

    # --- Default (bf16-operand) path, small batch -> single grid step. ------
    B = 8
    images = jax.random.normal(k_x, (B, IN_DIM), dtype=jnp.float32)
    out = jax.block_until_ready(solution_forward(images, w1, b1, w2, b2))
    ref = _ref_forward(images, w1, b1, w2, b2, jnp.bfloat16)
    assert out.shape == (B, OUT_DIM)
    # atol allows at most a couple of 1e-4 rounding ticks from accumulation-
    # order differences between the kernel and the XLA reference matmul.
    assert jnp.allclose(out, ref, atol=2e-4, rtol=0.0), "bf16 path mismatch"

    # --- f32 path, B not a multiple of the tile -> multi-step grid + pad. ---
    B2 = 20
    images2 = jax.random.normal(k_x, (B2, IN_DIM), dtype=jnp.float32)
    out2 = jax.block_until_ready(
        solution_forward(images2, w1, b1, w2, b2, tb=8, use_bf16=False))
    ref2 = _ref_forward(images2, w1, b1, w2, b2, jnp.float32)
    assert out2.shape == (B2, OUT_DIM)
    assert jnp.allclose(out2, ref2, atol=2e-4, rtol=0.0), "f32 path mismatch"

    print("KERNEL_OK")
</pallas_src>

<mosaic_0001>
module attributes {stable_mosaic.version = 11 : i64} {
  func.func @mlp_kernel(%arg0: i32, %arg1: memref<8x784xbf16, #tpu.memory_space<vmem>>, %arg2: memref<784x512xbf16, #tpu.memory_space<vmem>>, %arg3: memref<1x512xf32, #tpu.memory_space<vmem>>, %arg4: memref<512x10xbf16, #tpu.memory_space<vmem>>, %arg5: memref<1x10xf32, #tpu.memory_space<vmem>>, %arg6: memref<8x10xf32, #tpu.memory_space<vmem>>) attributes {dimension_semantics = [#tpu.dimension_semantics<parallel>], iteration_bounds = array<i64: 1>, scalar_prefetch = 0 : i64, scratch_operands = 0 : i64, tpu.core_type = #tpu.core_type<tc>, window_params = [{transform_indices = @transform_0, window_bounds = array<i64: 8, 784>}, {pipeline_mode = #tpu.pipeline_mode<synchronous>, transform_indices = @transform_1, window_bounds = array<i64: 784, 512>}, {pipeline_mode = #tpu.pipeline_mode<synchronous>, transform_indices = @transform_2, window_bounds = array<i64: 1, 512>}, {pipeline_mode = #tpu.pipeline_mode<synchronous>, transform_indices = @transform_3, window_bounds = array<i64: 512, 10>}, {pipeline_mode = #tpu.pipeline_mode<synchronous>, transform_indices = @transform_4, window_bounds = array<i64: 1, 10>}, {transform_indices = @transform_5, window_bounds = array<i64: 8, 10>}]} {
    %c0 = arith.constant 0 : index
    %c0_0 = arith.constant 0 : index
    %0 = vector.load %arg1[%c0, %c0_0] : memref<8x784xbf16, #tpu.memory_space<vmem>>, vector<8x784xbf16>
    %c0_1 = arith.constant 0 : index
    %c0_2 = arith.constant 0 : index
    %1 = vector.load %arg2[%c0_1, %c0_2] : memref<784x512xbf16, #tpu.memory_space<vmem>>, vector<784x512xbf16>
    %cst = arith.constant dense<0.000000e+00> : vector<8x512xf32>
    %2 = tpu.matmul %0, %1, %cst {dimension_numbers = #tpu.dot_dimension_numbers<[1], [0], [0], [1], [0, 0, 1, 1], [], []>} : vector<8x784xbf16>, vector<784x512xbf16>, vector<8x512xf32> -> vector<8x512xf32>
    %c0_3 = arith.constant 0 : index
    %c0_4 = arith.constant 0 : index
    %3 = vector.load %arg3[%c0_3, %c0_4] : memref<1x512xf32, #tpu.memory_space<vmem>>, vector<1x512xf32>
    %4 = vector.broadcast %3 : vector<1x512xf32> to vector<8x512xf32>
    %5 = arith.addf %2, %4 : vector<8x512xf32>
    %cst_5 = arith.constant 0.000000e+00 : f32
    %6 = vector.broadcast %cst_5 : f32 to vector<8x512xf32>
    %7 = arith.maximumf %5, %6 : vector<8x512xf32>
    %8 = arith.truncf %7 : vector<8x512xf32> to vector<8x512xbf16>
    %c0_6 = arith.constant 0 : index
    %c0_7 = arith.constant 0 : index
    %9 = vector.load %arg4[%c0_6, %c0_7] : memref<512x10xbf16, #tpu.memory_space<vmem>>, vector<512x10xbf16>
    %cst_8 = arith.constant dense<0.000000e+00> : vector<8x10xf32>
    %10 = tpu.matmul %8, %9, %cst_8 {dimension_numbers = #tpu.dot_dimension_numbers<[1], [0], [0], [1], [0, 0, 1, 1], [], []>} : vector<8x512xbf16>, vector<512x10xbf16>, vector<8x10xf32> -> vector<8x10xf32>
    %c0_9 = arith.constant 0 : index
    %c0_10 = arith.constant 0 : index
    %11 = vector.load %arg5[%c0_9, %c0_10] : memref<1x10xf32, #tpu.memory_space<vmem>>, vector<1x10xf32>
    %12 = vector.broadcast %11 : vector<1x10xf32> to vector<8x10xf32>
    %13 = arith.addf %10, %12 : vector<8x10xf32>
    %14 = arith.negf %13 : vector<8x10xf32>
    %15 = math.exp %14 : vector<8x10xf32>
    %cst_11 = arith.constant 1.000000e+00 : f32
    %16 = vector.broadcast %cst_11 : f32 to vector<8x10xf32>
    %17 = arith.addf %16, %15 : vector<8x10xf32>
    %18 = arith.divf %16, %17 : vector<8x10xf32>
    %cst_12 = arith.constant 1.000000e+04 : f32
    %19 = vector.broadcast %cst_12 : f32 to vector<8x10xf32>
    %20 = arith.mulf %18, %19 : vector<8x10xf32>
    %21 = math.roundeven %20 : vector<8x10xf32>
    %cst_13 = arith.constant 9.99999974E-5 : f32
    %22 = vector.broadcast %cst_13 : f32 to vector<8x10xf32>
    %23 = arith.mulf %21, %22 : vector<8x10xf32>
    %c0_14 = arith.constant 0 : index
    %c0_15 = arith.constant 0 : index
    %24 = vector.load %arg6[%c0_14, %c0_15] : memref<8x10xf32, #tpu.memory_space<vmem>>, vector<8x10xf32>
    tpu.vector_store %arg6[%c0_14, %c0_15], %23 {strides = array<i32>} : memref<8x10xf32, #tpu.memory_space<vmem>>, vector<8x10xf32>,
    return
  }
  func.func @transform_0(%arg0: i32) -> (i32, i32) {
    %c0_i32 = arith.constant 0 : i32
    %c0_i32_0 = arith.constant 0 : i32
    return %arg0, %c0_i32 : i32, i32
  }
  func.func @transform_1(%arg0: i32) -> (i32, i32) {
    %c0_i32 = arith.constant 0 : i32
    %c0_i32_0 = arith.constant 0 : i32
    %c0_i32_1 = arith.constant 0 : i32
    return %c0_i32, %c0_i32_0 : i32, i32
  }
  func.func @transform_2(%arg0: i32) -> (i32, i32) {
    %c0_i32 = arith.constant 0 : i32
    %c0_i32_0 = arith.constant 0 : i32
    %c0_i32_1 = arith.constant 0 : i32
    return %c0_i32, %c0_i32_0 : i32, i32
  }
  func.func @transform_3(%arg0: i32) -> (i32, i32) {
    %c0_i32 = arith.constant 0 : i32
    %c0_i32_0 = arith.constant 0 : i32
    %c0_i32_1 = arith.constant 0 : i32
    return %c0_i32, %c0_i32_0 : i32, i32
  }
  func.func @transform_4(%arg0: i32) -> (i32, i32) {
    %c0_i32 = arith.constant 0 : i32
    %c0_i32_0 = arith.constant 0 : i32
    %c0_i32_1 = arith.constant 0 : i32
    return %c0_i32, %c0_i32_0 : i32, i32
  }
  func.func @transform_5(%arg0: i32) -> (i32, i32) {
    %c0_i32 = arith.constant 0 : i32
    %c0_i32_0 = arith.constant 0 : i32
    return %arg0, %c0_i32 : i32, i32
  }
}

</mosaic_0001>

<bundles_post_ra>
// kernel: tpu_custom_call.1
= control target key start
LH: loop header
LB: loop body
LE: loop exit
PB: predicated region body
PF: predicated region fallthrough
CT: control target
= control target key end

     0   :  { %10 = vsyncpa [#allocation3], 0  ;;  %s3413_s0 = inlined_call_operand.vmem [shape: bf16[8,784], index: 0, kind: input, shape index: {}]   ;;  %s3414_s1 = inlined_call_operand.hbm [shape: bf16[784,512], index: 1, kind: input, shape index: {}]   ;;  %s3415_s2 = inlined_call_operand.vmem [shape: f32[1,512], index: 2, kind: input, shape index: {}]   ;;  %s3416_s3 = inlined_call_operand.vmem [shape: bf16[512,10], index: 3, kind: input, shape index: {}]   ;;  %s3417_s4 = inlined_call_operand.vmem [shape: f32[1,10], index: 4, kind: input, shape index: {}]   ;;  %s3418_s5 = inlined_call_operand.hbm [shape: f32[8,10], index: 5, kind: output, shape index: {}]  }
   0x1   :  { %11 = vsyncpa [#allocation4], 0  ;;  %s18_s20 = sshll.u32 %s3414_s1, 4  ;;  %s3195_s21 = smov [#allocation2]   ;;  %s19_s20 = int_to_ptr.hbm [resolvable:$true] %s18_s20 }
   0x2   :  { %s20_s22 = sshll.u32 %s3195_s21, 4  ;;  %s3196_s23 = smov 256   ;;  %s21_s22 = int_to_ptr.vmem [resolvable:$true] %s20_s22 }
   0x3   :  { %s3197_s24 = smov 16  }
   0x4   :  { %26 = dma.hbm_to_vmem [thread:$0]  %s19_s20, 25088, %s21_s22, [#allocation3], %s3196_s23, %s3196_s23, %s3197_s24  }
   0x5   :  { %3191 = dma.done.wait [#allocation3], 25088  }
   0x6   :  { %3192 = vsyncadd [#allocation3], 4294942208  ;;  %v2095_v0 = vld [vmem:[#allocation2 + $0xe0] sm:$0xf]  ;;  %v2928_v1 = vld [vmem:[#allocation2 + $0xec] sm:$0xf0] }
   0x7   :  { %v2223_v2 = vld [vmem:[#allocation2 + $0x1e0] sm:$0xf]  ;;  %v2096_v3 = vor.u32 %v2928_v1, %v2095_v0  ;;  %v2960_v4 = vld [vmem:[#allocation2 + $0x1ec] sm:$0xf0]  ;;  %vm1252_vm0 = vcmask 130048   ;;  %s1971_s19 = sshll.u32 %s3418_s5, 4  ;;  %s1972_s19 = int_to_ptr.hbm [resolvable:$true] %s1971_s19 }
   0x8   :  { %v2351_v5 = vld [vmem:[#allocation2 + $0x2e0] sm:$0xf]  ;;  %v2992_v6 = vld [vmem:[#allocation2 + $0x2ec] sm:$0xf0]  ;;  %v2224_v7 = vor.u32 %v2960_v4, %v2223_v2  ;;  %vm1962_vm6 = vcmask 80896  }
   0x9   :  { %v2352_v8 = vor.u32 %v2992_v6, %v2351_v5  ;;  %v2479_v9 = vld [vmem:[#allocation2 + $0x3e0] sm:$0xf]  ;;  %v3024_v10 = vld [vmem:[#allocation2 + $0x3ec] sm:$0xf0]  ;;  %1256 = vmatpush.bf16.msra.mxu0 %v2096_v3 }
   0xa   :  { %v2079_v11 = vld [vmem:[#allocation2 + $0xc0] sm:$0xf]  ;;  %v2480_v12 = vor.u32 %v3024_v10, %v2479_v9  ;;  %v2924_v13 = vld [vmem:[#allocation2 + $0xcc] sm:$0xf0]  ;;  %1269 = vmatpush.bf16.msra.mxu1 %v2224_v7 }
   0xb   :  { %v2207_v14 = vld [vmem:[#allocation2 + $0x1c0] sm:$0xf]  ;;  %v2956_v15 = vld [vmem:[#allocation2 + $0x1cc] sm:$0xf0]  ;;  %1282 = vmatpush.bf16.msra.mxu2 %v2352_v8  ;;  %v2080_v16 = vor.u32 %v2924_v13, %v2079_v11 }
   0xc   :  { %v2208_v17 = vor.u32 %v2956_v15, %v2207_v14  ;;  %v2335_v18 = vld [vmem:[#allocation2 + $0x2c0] sm:$0xf]  ;;  %v2988_v19 = vld [vmem:[#allocation2 + $0x2cc] sm:$0xf0]  ;;  %1295 = vmatpush.bf16.msra.mxu3 %v2480_v12 }
   0xd   :  { %v2463_v20 = vld [vmem:[#allocation2 + $0x3c0] sm:$0xf]  ;;  %v2336_v21 = vor.u32 %v2988_v19, %v2335_v18  ;;  %v3020_v22 = vld [vmem:[#allocation2 + $0x3cc] sm:$0xf0]  ;;  %1257 = vmatpush.bf16.msra.mxu0 %v2080_v16 }
   0xe   :  { %v2063_v23 = vld [vmem:[#allocation2 + $0xa0] sm:$0xf]  ;;  %v2920_v24 = vld [vmem:[#allocation2 + $0xac] sm:$0xf0]  ;;  %v2464_v25 = vor.u32 %v3020_v22, %v2463_v20  ;;  %1270 = vmatpush.bf16.msra.mxu1 %v2208_v17 }
   0xf   :  { %v2191_v26 = vld [vmem:[#allocation2 + $0x1a0] sm:$0xf]  ;;  %v2952_v27 = vld [vmem:[#allocation2 + $0x1ac] sm:$0xf0]  ;;  %v2064_v29 = vor.u32 %v2920_v24, %v2063_v23  ;;  %1283 = vmatpush.bf16.msra.mxu2 %v2336_v21 }
  0x10   :  { %v2319_v28 = vld [vmem:[#allocation2 + $0x2a0] sm:$0xf]  ;;  %v2984_v30 = vld [vmem:[#allocation2 + $0x2ac] sm:$0xf0]  ;;  %v2192_v33 = vor.u32 %v2952_v27, %v2191_v26  ;;  %1296 = vmatpush.bf16.msra.mxu3 %v2464_v25  ;;  %v39_v25 = vld [vmem:[%s3413_s0 + $0x8] sm:$0xff] }
  0x11   :  { %v2447_v31 = vld [vmem:[#allocation2 + $0x3a0] sm:$0xf]  ;;  %v3016_v32 = vld [vmem:[#allocation2 + $0x3ac] sm:$0xf0]  ;;  %v2320_v34 = vor.u32 %v2984_v30, %v2319_v28  ;;  %1258 = vmatpush.bf16.msra.mxu0 %v2064_v29 }
  0x12   :  { %v2047_v35 = vld [vmem:[#allocation2 + $0x80] sm:$0xf]  ;;  %v2916_v36 = vld [vmem:[#allocation2 + $0x8c] sm:$0xf0]  ;;  %v2448_v38 = vor.u32 %v3016_v32, %v2447_v31  ;;  %1271 = vmatpush.bf16.msra.mxu1 %v2192_v33 }
  0x13   :  { %v2175_v37 = vld [vmem:[#allocation2 + $0x180] sm:$0xf]  ;;  %v2948_v39 = vld [vmem:[#allocation2 + $0x18c] sm:$0xf0]  ;;  %v2048_v44 = vor.u32 %v2916_v36, %v2047_v35  ;;  %1284 = vmatpush.bf16.msra.mxu2 %v2320_v34  ;;  %v2926_v34 = vld [vmem:[#allocation2 + $0xe4] sm:$0xf]  ;;  %v254_v36 = vunpack.c.l.b16 %v39_v25 }
  0x14   :  { %v2303_v40 = vld [vmem:[#allocation2 + $0x280] sm:$0xf]  ;;  %v2980_v41 = vld [vmem:[#allocation2 + $0x28c] sm:$0xf0]  ;;  %v2176_v45 = vor.u32 %v2948_v39, %v2175_v37  ;;  %1297 = vmatpush.bf16.msra.mxu3 %v2448_v38  ;;  %v2097_v35 = vld [vmem:[#allocation2 + $0xf0] sm:$0xf0] }
  0x15   :  { %v2431_v42 = vld [vmem:[#allocation2 + $0x380] sm:$0xf]  ;;  %v3012_v43 = vld [vmem:[#allocation2 + $0x38c] sm:$0xf0]  ;;  %v2304_v46 = vor.u32 %v2980_v41, %v2303_v40  ;;  %1259 = vmatpush.bf16.msra.mxu0 %v2048_v44 }
  0x16   :  { %v2031_v47 = vld [vmem:[#allocation2 + $0x60] sm:$0xf]  ;;  %v2912_v48 = vld [vmem:[#allocation2 + $0x6c] sm:$0xf0]  ;;  %v2432_v50 = vor.u32 %v3012_v43, %v2431_v42  ;;  %1272 = vmatpush.bf16.msra.mxu1 %v2176_v45  ;;  %v255_v42 = vunpack.c.h.b16 %v39_v25  ;;  %v2946_v25 = vld [vmem:[#allocation2 + $0x184] sm:$0xf] }
  0x17   :  { %v2159_v49 = vld [vmem:[#allocation2 + $0x160] sm:$0xf]  ;;  %v2944_v51 = vld [vmem:[#allocation2 + $0x16c] sm:$0xf0]  ;;  %v2032_v56 = vor.u32 %v2912_v48, %v2031_v47  ;;  %1285 = vmatpush.bf16.msra.mxu2 %v2304_v46  ;;  %v2958_v46 = vld [vmem:[#allocation2 + $0x1e4] sm:$0xf] }
  0x18   :  { %v2287_v52 = vld [vmem:[#allocation2 + $0x260] sm:$0xf]  ;;  %v2976_v53 = vld [vmem:[#allocation2 + $0x26c] sm:$0xf0]  ;;  %v2160_v57 = vor.u32 %v2944_v51, %v2159_v49  ;;  %1298 = vmatpush.bf16.msra.mxu3 %v2432_v50  ;;  %v2225_v47 = vld [vmem:[#allocation2 + $0x1f0] sm:$0xf0]  ;;  %v2100_v49 = vor.u32 %v2926_v34, %v2097_v35 }
  0x19   :  { %v2415_v54 = vld [vmem:[#allocation2 + $0x360] sm:$0xf]  ;;  %v3008_v55 = vld [vmem:[#allocation2 + $0x36c] sm:$0xf0]  ;;  %v2288_v58 = vor.u32 %v2976_v53, %v2287_v52  ;;  %1260 = vmatpush.bf16.msra.mxu0 %v2032_v56  ;;  %v3238_v53 = vpack.c.b16 %v254_v36, %v254_v36  ;;  %v2081_v56 = vld [vmem:[#allocation2 + $0xd0] sm:$0xf0] }
  0x1a   :  { %v2015_v59 = vld [vmem:[#allocation2 + $0x40] sm:$0xf]  ;;  %v2908_v60 = vld [vmem:[#allocation2 + $0x4c] sm:$0xf0]  ;;  %v2416_v62 = vor.u32 %v3008_v55, %v2415_v54  ;;  %1273 = vmatpush.bf16.msra.mxu1 %v2160_v57  ;;  %v2922_v55 = vld [vmem:[#allocation2 + $0xc4] sm:$0xf] }
  0x1b   :  { %v2143_v61 = vld [vmem:[#allocation2 + $0x140] sm:$0xf]  ;;  %v2940_v63 = vld [vmem:[#allocation2 + $0x14c] sm:$0xf0]  ;;  %v2016_v4 = vor.u32 %v2908_v60, %v2015_v59  ;;  %1286 = vmatpush.bf16.msra.mxu2 %v2288_v58  ;;  %v3242_v60 = vpack.c.b16 %v255_v42, %v255_v42  ;;  %v2033_v34 = vld [vmem:[#allocation2 + $0x70] sm:$0xf0] }
  0x1c   :  { %v2271_v0 = vld [vmem:[#allocation2 + $0x240] sm:$0xf]  ;;  %v2972_v1 = vld [vmem:[#allocation2 + $0x24c] sm:$0xf0]  ;;  %v2144_v5 = vor.u32 %v2940_v63, %v2143_v61  ;;  %1299 = vmatpush.bf16.msra.mxu3 %v2416_v62  ;;  %v2228_v61 = vor.u32 %v2958_v46, %v2225_v47  ;;  %v2954_v63 = vld [vmem:[#allocation2 + $0x1c4] sm:$0xf] }
  0x1d   :  { %v2399_v2 = vld [vmem:[#allocation2 + $0x340] sm:$0xf]  ;;  %v3004_v3 = vld [vmem:[#allocation2 + $0x34c] sm:$0xf0]  ;;  %v2272_v6 = vor.u32 %v2972_v1, %v2271_v0  ;;  %1261 = vmatpush.bf16.msra.mxu0 %v2016_v4  ;;  %v2209_v0 = vld [vmem:[#allocation2 + $0x1d0] sm:$0xf0] }
  0x1e   :  { %v1999_v7 = vld [vmem:[#allocation2 + $0x20] sm:$0xf]  ;;  %v2904_v8 = vld [vmem:[#allocation2 + $0x2c] sm:$0xf0]  ;;  %v2400_v10 = vor.u32 %v3004_v3, %v2399_v2  ;;  %1274 = vmatpush.bf16.msra.mxu1 %v2144_v5  ;;  %v2084_v2 = vor.u32 %v2922_v55, %v2081_v56  ;;  %v2906_v46 = vld [vmem:[#allocation2 + $0x44] sm:$0xf] }
  0x1f   :  { %v2127_v9 = vld [vmem:[#allocation2 + $0x120] sm:$0xf]  ;;  %v2936_v11 = vld [vmem:[#allocation2 + $0x12c] sm:$0xf0]  ;;  %v2000_v17 = vor.u32 %v2904_v8, %v1999_v7  ;;  %1287 = vmatpush.bf16.msra.mxu2 %v2272_v6  ;;  %v2918_v7 = vld [vmem:[#allocation2 + $0xa4] sm:$0xf] }
  0x20   :  { %v2255_v12 = vld [vmem:[#allocation2 + $0x220] sm:$0xf]  ;;  %v2968_v13 = vld [vmem:[#allocation2 + $0x22c] sm:$0xf0]  ;;  %v2128_v21 = vor.u32 %v2936_v11, %v2127_v9  ;;  %1300 = vmatpush.bf16.msra.mxu3 %v2400_v10  ;;  %v2065_v8 = vld [vmem:[#allocation2 + $0xb0] sm:$0xf0]  ;;  %v2212_v10 = vor.u32 %v2954_v63, %v2209_v0 }
  0x21   :  { %v2383_v14 = vld [vmem:[#allocation2 + $0x320] sm:$0xf]  ;;  %v3000_v15 = vld [vmem:[#allocation2 + $0x32c] sm:$0xf0]  ;;  %v2256_v22 = vor.u32 %v2968_v13, %v2255_v12  ;;  %1262 = vmatpush.bf16.msra.mxu0 %v2000_v17  ;;  %v2950_v12 = vld [vmem:[#allocation2 + $0x1a4] sm:$0xf] }
  0x22   :  { %v1983_v16 = vld [vmem:[#allocation2] sm:$0xf]  ;;  %v2900_v18 = vld [vmem:[#allocation2 + $0xc] sm:$0xf0]  ;;  %v2384_v26 = vor.u32 %v3000_v15, %v2383_v14  ;;  %1275 = vmatpush.bf16.msra.mxu1 %v2128_v21  ;;  %v2193_v13 = vld [vmem:[#allocation2 + $0x1b0] sm:$0xf0]  ;;  %v2068_v15 = vor.u32 %v2918_v7, %v2065_v8 }
  0x23   :  { %v2111_v19 = vld [vmem:[#allocation2 + $0x100] sm:$0xf]  ;;  %v2932_v20 = vld [vmem:[#allocation2 + $0x10c] sm:$0xf0]  ;;  %v1984_v33 = vor.u32 %v2900_v18, %v1983_v16  ;;  %1288 = vmatpush.bf16.msra.mxu2 %v2256_v22  ;;  %v2049_v21 = vld [vmem:[#allocation2 + $0x90] sm:$0xf0] }
  0x24   :  { %v2239_v23 = vld [vmem:[#allocation2 + $0x200] sm:$0xf]  ;;  %v2964_v24 = vld [vmem:[#allocation2 + $0x20c] sm:$0xf0]  ;;  %v2112_v38 = vor.u32 %v2932_v20, %v2111_v19  ;;  %1301 = vmatpush.bf16.msra.mxu3 %v2384_v26  ;;  %v2914_v20 = vld [vmem:[#allocation2 + $0x84] sm:$0xf] }
  0x25   :  { %v2367_v27 = vld [vmem:[#allocation2 + $0x300] sm:$0xf]  ;;  %v2996_v28 = vld [vmem:[#allocation2 + $0x30c] sm:$0xf0]  ;;  %v2240_v39 = vor.u32 %v2964_v24, %v2239_v23  ;;  %1263 = vmatpush.bf16.msra.mxu0 %v1984_v33  ;;  %v41_v22 = vld [vmem:[%s3413_s0 + $0x18] sm:$0xf]  ;;  %v2196_v23 = vor.u32 %v2950_v12, %v2193_v13 }
  0x26   :  { %v2607_v29 = vld [vmem:[#allocation2 + $0x4e0] sm:$0xf]  ;;  %v3056_v30 = vld [vmem:[#allocation2 + $0x4ec] sm:$0xf0]  ;;  %v2368_v43 = vor.u32 %v2996_v28, %v2367_v27  ;;  %1276 = vmatpush.bf16.msra.mxu1 %v2112_v38  ;;  %v2177_v26 = vld [vmem:[#allocation2 + $0x190] sm:$0xf0]  ;;  %v2052_v28 = vor.u32 %v2914_v20, %v2049_v21  ;;  %v258_v35 = vunpack.c.l.b16 %v41_v22 }
  0x27   :  { %v2735_v31 = vld [vmem:[#allocation2 + $0x5e0] sm:$0xf]  ;;  %v3088_v32 = vld [vmem:[#allocation2 + $0x5ec] sm:$0xf0]  ;;  %v2608_v44 = vor.u32 %v3056_v30, %v2607_v29  ;;  %1289 = vmatpush.bf16.msra.mxu2 %v2240_v39  ;;  %v2910_v33 = vld [vmem:[#allocation2 + $0x64] sm:$0xf]  ;;  %v2180_v36 = vor.u32 %v2946_v25, %v2177_v26 }
  0x28   :  { %v38_v37 = vld [vmem:[%s3413_s0] sm:$0xff]  ;;  %v3092_v45 = vld [vmem:[#allocation2 + $0x60c] sm:$0xf0]  ;;  %v2736_v48 = vor.u32 %v3088_v32, %v2735_v31  ;;  %1302 = vmatpush.bf16.msra.mxu3 %v2368_v43  ;;  %v2161_v39 = vld [vmem:[#allocation2 + $0x170] sm:$0xf0] }
  0x29   :  { %v2751_v40 = vld [vmem:[#allocation2 + $0x600] sm:$0xf]  ;;  %v252_v41 = vunpack.c.l.b16 %v38_v37  ;;  %v3052_v51 = vld [vmem:[#allocation2 + $0x4cc] sm:$0xf0]  ;;  %v253_v58 = vunpack.c.h.b16 %v38_v37  ;;  %1308 = vmatpush.bf16.msrb.mxu0 %v2608_v44  ;;  %v2942_v38 = vld [vmem:[#allocation2 + $0x164] sm:$0xf] }
  0x2a   :  { %v2591_v50 = vld [vmem:[#allocation2 + $0x4c0] sm:$0xf]  ;;  %v3084_v54 = vld [vmem:[#allocation2 + $0x5cc] sm:$0xf0]  ;;  %v2752_v59 = vor.u32 %v3092_v45, %v2751_v40  ;;  %1321 = vmatpush.bf16.msrb.mxu1 %v2736_v48  ;;  %1290 = vmatmul.bf16.vlgmr.msra.gmra.mxu2 %v3238_v53  ;;  %v2017_v47 = vld [vmem:[#allocation2 + $0x50] sm:$0xf0]  ;;  %v3253_v48 = vpack.c.b16 %v258_v35, %v258_v35 }
  0x2b   :  { %v2719_v52 = vld [vmem:[#allocation2 + $0x5c0] sm:$0xf]  ;;  %v3240_v57 = vpack.c.b16 %v252_v41, %v252_v41  ;;  %v2592_v62 = vor.u32 %v3052_v51, %v2591_v50  ;;  %v3048_v4 = vld [vmem:[#allocation2 + $0x4ac] sm:$0xf0]  ;;  %v3246_v9 = vpack.c.b16 %v253_v58, %v253_v58  ;;  %1303 = vmatmul.bf16.vlgmr.msra.gmra.mxu3 %v3242_v60  ;;  %v2036_v41 = vor.u32 %v2910_v33, %v2033_v34  ;;  %v2938_v51 = vld [vmem:[#allocation2 + $0x144] sm:$0xf] }
  0x2c   :  { %1347 = vmatpush.bf16.msrb.mxu3 %v2100_v49  ;;  %v2720_v1 = vor.u32 %v3084_v54, %v2719_v52  ;;  %v2575_v3 = vld [vmem:[#allocation2 + $0x4a0] sm:$0xf]  ;;  %v3080_v6 = vld [vmem:[#allocation2 + $0x5ac] sm:$0xf0]  ;;  %1341 = vmatpush.bf16.msrb.mxu2 %v2752_v59  ;;  %v2164_v49 = vor.u32 %v2942_v38, %v2161_v39  ;;  %v2145_v52 = vld [vmem:[#allocation2 + $0x150] sm:$0xf0]  ;;  %v2020_v55 = vor.u32 %v2906_v46, %v2017_v47 }
  0x2d   :  { %v2703_v5 = vld [vmem:[#allocation2 + $0x5a0] sm:$0xf]  ;;  %1264 = vmatmul.bf16.vlgmr.msra.gmra.mxu0 %v3240_v57  ;;  %v2576_v11 = vor.u32 %v3048_v4, %v2575_v3  ;;  %v3044_v17 = vld [vmem:[#allocation2 + $0x48c] sm:$0xf0]  ;;  %1277 = vmatmul.bf16.vlgmr.msra.gmra.mxu1 %v3246_v9  ;;  %v2001_v63 = vld [vmem:[#allocation2 + $0x30] sm:$0xf0] }
  0x2e   :  { %1309 = vmatpush.bf16.msrb.mxu0 %v2592_v62  ;;  %1322 = vmatpush.bf16.msrb.mxu1 %v2720_v1  ;;  %v2704_v14 = vor.u32 %v3080_v6, %v2703_v5  ;;  %v2559_v16 = vld [vmem:[#allocation2 + $0x480] sm:$0xf]  ;;  %v3076_v19 = vld [vmem:[#allocation2 + $0x58c] sm:$0xf0]  ;;  %v2902_v62 = vld [vmem:[#allocation2 + $0x24] sm:$0xf]  ;;  %v2148_v1 = vor.u32 %v2938_v51, %v2145_v52 }
  0x2f   :  { %v2687_v18 = vld [vmem:[#allocation2 + $0x580] sm:$0xf]  ;;  %v2560_v24 = vor.u32 %v3044_v17, %v2559_v16  ;;  %v3040_v30 = vld [vmem:[#allocation2 + $0x46c] sm:$0xf0]  ;;  %v2934_v0 = vld [vmem:[#allocation2 + $0x124] sm:$0xf]  ;;  %v2004_v7 = vor.u32 %v2902_v62, %v2001_v63 }
  0x30   :  { %1360 = vmatpush.bf16.msra.mxu2 %v2228_v61  ;;  %1348 = vmatpush.bf16.msrb.mxu3 %v2084_v2  ;;  %v2688_v27 = vor.u32 %v3076_v19, %v2687_v18  ;;  %v2543_v29 = vld [vmem:[#allocation2 + $0x460] sm:$0xf]  ;;  %v3072_v32 = vld [vmem:[#allocation2 + $0x56c] sm:$0xf0]  ;;  %v2129_v3 = vld [vmem:[#allocation2 + $0x130] sm:$0xf0] }
  0x31   :  { %v2671_v31 = vld [vmem:[#allocation2 + $0x560] sm:$0xf]  ;;  %v2544_v37 = vor.u32 %v3040_v30, %v2543_v29  ;;  %v3036_v43 = vld [vmem:[#allocation2 + $0x44c] sm:$0xf0]  ;;  %v2898_v12 = vld [vmem:[#allocation2 + $0x4] sm:$0xf]  ;;  %v2132_v19 = vor.u32 %v2934_v0, %v2129_v3 }
  0x32   :  { %1310 = vmatpush.bf16.msrb.mxu0 %v2576_v11  ;;  %1323 = vmatpush.bf16.msrb.mxu1 %v2704_v14  ;;  %v2672_v40 = vor.u32 %v3072_v32, %v2671_v31  ;;  %v2527_v42 = vld [vmem:[#allocation2 + $0x440] sm:$0xf]  ;;  %v3068_v45 = vld [vmem:[#allocation2 + $0x54c] sm:$0xf0]  ;;  %v1985_v13 = vld [vmem:[#allocation2 + $0x10] sm:$0xf0] }
  0x33   :  { %v2655_v44 = vld [vmem:[#allocation2 + $0x540] sm:$0xf]  ;;  %v2528_v50 = vor.u32 %v3036_v43, %v2527_v42  ;;  %v3032_v58 = vld [vmem:[#allocation2 + $0x42c] sm:$0xf0]  ;;  %v2990_v14 = vld [vmem:[#allocation2 + $0x2e4] sm:$0xf]  ;;  %v1988_v25 = vor.u32 %v2898_v12, %v1985_v13 }
  0x34   :  { %1361 = vmatpush.bf16.msra.mxu2 %v2212_v10  ;;  %1349 = vmatpush.bf16.msrb.mxu3 %v2068_v15  ;;  %v2656_v54 = vor.u32 %v3068_v45, %v2655_v44  ;;  %v2511_v56 = vld [vmem:[#allocation2 + $0x420] sm:$0xf]  ;;  %v3064_v61 = vld [vmem:[#allocation2 + $0x52c] sm:$0xf0]  ;;  %v2353_v15 = vld [vmem:[#allocation2 + $0x2f0] sm:$0xf0] }
  0x35   :  { %v2639_v59 = vld [vmem:[#allocation2 + $0x520] sm:$0xf]  ;;  %v2512_v2 = vor.u32 %v3032_v58, %v2511_v56  ;;  %v40_v5 = vld [vmem:[%s3413_s0 + $0x10] sm:$0xff]  ;;  %v3022_v16 = vld [vmem:[#allocation2 + $0x3e4] sm:$0xf] }
  0x36   :  { %1311 = vmatpush.bf16.msrb.mxu0 %v2560_v24  ;;  %1324 = vmatpush.bf16.msrb.mxu1 %v2688_v27  ;;  %v2495_v4 = vld [vmem:[#allocation2 + $0x400] sm:$0xf]  ;;  %v2640_v6 = vor.u32 %v3064_v61, %v2639_v59  ;;  %v3028_v8 = vld [vmem:[#allocation2 + $0x40c] sm:$0xf0]  ;;  %v2481_v17 = vld [vmem:[#allocation2 + $0x3f0] sm:$0xf0]  ;;  %v256_v18 = vunpack.c.l.b16 %v40_v5 }
  0x37   :  { %v2623_v10 = vld [vmem:[#allocation2 + $0x500] sm:$0xf]  ;;  %v3060_v11 = vld [vmem:[#allocation2 + $0x50c] sm:$0xf0]  ;;  %v2496_v20 = vor.u32 %v3028_v8, %v2495_v4  ;;  %v3054_v21 = vld [vmem:[#allocation2 + $0x4e4] sm:$0xf]  ;;  %v2484_v29 = vor.u32 %v3022_v16, %v2481_v17 }
  0x38   :  { %1362 = vmatpush.bf16.msra.mxu2 %v2196_v23  ;;  %1350 = vmatpush.bf16.msrb.mxu3 %v2052_v28  ;;  %v2609_v22 = vld [vmem:[#allocation2 + $0x4f0] sm:$0xf0]  ;;  %v257_v23 = vunpack.c.h.b16 %v40_v5  ;;  %v2624_v24 = vor.u32 %v3060_v11, %v2623_v10  ;;  %v2930_v26 = vld [vmem:[#allocation2 + $0x104] sm:$0xf]  ;;  %v2356_v28 = vor.u32 %v2990_v14, %v2353_v15  ;;  %v3260_v34 = vpack.c.b16 %v256_v18, %v256_v18 }
  0x39   :  { %v2113_v27 = vld [vmem:[#allocation2 + $0x110] sm:$0xf0]  ;;  %v3086_v30 = vld [vmem:[#allocation2 + $0x5e4] sm:$0xf]  ;;  %v2612_v33 = vor.u32 %v3054_v21, %v2609_v22 }
  0x3a   :  { %1312 = vmatpush.bf16.msrb.mxu0 %v2544_v37  ;;  %1325 = vmatpush.bf16.msrb.mxu1 %v2672_v40  ;;  %v2737_v31 = vld [vmem:[#allocation2 + $0x5f0] sm:$0xf0]  ;;  %v2986_v32 = vld [vmem:[#allocation2 + $0x2c4] sm:$0xf]  ;;  %v2116_v38 = vor.u32 %v2930_v26, %v2113_v27  ;;  %v3262_v39 = vpack.c.b16 %v257_v23, %v257_v23 }
  0x3b   :  { %2765 = vmatmul.msk.bf16.vlgmr.msrb.gmra.mxu2 %vm1252_vm0, %v3253_v48  ;;  %v2337_v35 = vld [vmem:[#allocation2 + $0x2d0] sm:$0xf0]  ;;  %v3050_v40 = vld [vmem:[#allocation2 + $0x4c4] sm:$0xf]  ;;  %v2740_v42 = vor.u32 %v3086_v30, %v2737_v31 }
  0x3c   :  { %1363 = vmatpush.bf16.msra.mxu2 %v2180_v36  ;;  %1351 = vmatpush.bf16.msrb.mxu3 %v2036_v41  ;;  %v3018_v36 = vld [vmem:[#allocation2 + $0x3c4] sm:$0xf]  ;;  %v2465_v37 = vld [vmem:[#allocation2 + $0x3d0] sm:$0xf0]  ;;  %v2340_v43 = vor.u32 %v2986_v32, %v2337_v35 }
  0x3d   :  { %v2593_v41 = vld [vmem:[#allocation2 + $0x4d0] sm:$0xf0]  ;;  %v2468_v44 = vor.u32 %v3018_v36, %v2465_v37  ;;  %v3082_v45 = vld [vmem:[#allocation2 + $0x5c4] sm:$0xf] }
  0x3e   :  { %1313 = vmatpush.bf16.msrb.mxu0 %v2528_v50  ;;  %1326 = vmatpush.bf16.msrb.mxu1 %v2656_v54  ;;  %v2721_v46 = vld [vmem:[#allocation2 + $0x5d0] sm:$0xf0]  ;;  %v2982_v47 = vld [vmem:[#allocation2 + $0x2a4] sm:$0xf] }
  0x3f   :  { %v2321_v50 = vld [vmem:[#allocation2 + $0x2b0] sm:$0xf0]  ;;  %v3014_v51 = vld [vmem:[#allocation2 + $0x3a4] sm:$0xf]  ;;  %v2724_v56 = vor.u32 %v3082_v45, %v2721_v46 }
  0x40   :  { %1364 = vmatpush.bf16.msra.mxu2 %v2164_v49  ;;  %1352 = vmatpush.bf16.msrb.mxu3 %v2020_v55  ;;  %v2596_v49 = vor.u32 %v3050_v40, %v2593_v41  ;;  %v2449_v52 = vld [vmem:[#allocation2 + $0x3b0] sm:$0xf0]  ;;  %v3046_v54 = vld [vmem:[#allocation2 + $0x4a4] sm:$0xf]  ;;  %v2324_v58 = vor.u32 %v2982_v47, %v2321_v50 }
  0x41   :  { %v2577_v55 = vld [vmem:[#allocation2 + $0x4b0] sm:$0xf0]  ;;  %v2452_v59 = vor.u32 %v3014_v51, %v2449_v52  ;;  %v3078_v61 = vld [vmem:[#allocation2 + $0x5a4] sm:$0xf] }
  0x42   :  { %1314 = vmatpush.bf16.msrb.mxu0 %v2512_v2  ;;  %1327 = vmatpush.bf16.msrb.mxu1 %v2640_v6  ;;  %v2705_v62 = vld [vmem:[#allocation2 + $0x5b0] sm:$0xf0]  ;;  %v2978_v63 = vld [vmem:[#allocation2 + $0x284] sm:$0xf]  ;;  %v2580_v0 = vor.u32 %v3046_v54, %v2577_v55 }
  0x43   :  { %v3010_v2 = vld [vmem:[#allocation2 + $0x384] sm:$0xf]  ;;  %v2433_v3 = vld [vmem:[#allocation2 + $0x390] sm:$0xf0]  ;;  %v2708_v6 = vor.u32 %v3078_v61, %v2705_v62  ;;  %v2103_v61 = vld [vmem:[#allocation2 + $0xe8] sm:$0xf] }
  0x44   :  { %1365 = vmatpush.bf16.msra.mxu2 %v2148_v1  ;;  %1353 = vmatpush.bf16.msrb.mxu3 %v2004_v7  ;;  %v2305_v1 = vld [vmem:[#allocation2 + $0x290] sm:$0xf0]  ;;  %v3042_v4 = vld [vmem:[#allocation2 + $0x484] sm:$0xf]  ;;  %v2436_v8 = vor.u32 %v3010_v2, %v2433_v3  ;;  %v2929_v62 = vld [vmem:[#allocation2 + $0xf4] sm:$0xf0] }
  0x45   :  { %v2561_v5 = vld [vmem:[#allocation2 + $0x490] sm:$0xf0]  ;;  %v2308_v7 = vor.u32 %v2978_v63, %v2305_v1  ;;  %v3074_v10 = vld [vmem:[#allocation2 + $0x584] sm:$0xf]  ;;  %v2359_v2 = vld [vmem:[#allocation2 + $0x2e8] sm:$0xf] }
  0x46   :  { %1315 = vmatpush.bf16.msrb.mxu0 %v2496_v20  ;;  %1328 = vmatpush.bf16.msrb.mxu1 %v2624_v24  ;;  %v2689_v11 = vld [vmem:[#allocation2 + $0x590] sm:$0xf0]  ;;  %v2974_v12 = vld [vmem:[#allocation2 + $0x264] sm:$0xf]  ;;  %v2564_v13 = vor.u32 %v3042_v4, %v2561_v5  ;;  %v2993_v3 = vld [vmem:[#allocation2 + $0x2f4] sm:$0xf0] }
  0x47   :  { %v2289_v14 = vld [vmem:[#allocation2 + $0x270] sm:$0xf0]  ;;  %v3006_v15 = vld [vmem:[#allocation2 + $0x364] sm:$0xf] }
  0x48   :  { %1366 = vmatpush.bf16.msra.mxu2 %v2132_v19  ;;  %1354 = vmatpush.bf16.msrb.mxu3 %v1988_v25  ;;  %v2417_v16 = vld [vmem:[#allocation2 + $0x370] sm:$0xf0]  ;;  %v3038_v17 = vld [vmem:[#allocation2 + $0x464] sm:$0xf]  ;;  %v2692_v19 = vor.u32 %v3074_v10, %v2689_v11  ;;  %v2292_v20 = vor.u32 %v2974_v12, %v2289_v14  ;;  %v2104_v10 = vor.u32 %v2929_v62, %v2103_v61  ;;  %v2487_v11 = vld [vmem:[#allocation2 + $0x3e8] sm:$0xf] }
  0x49   :  { %1316 = vmatmul.bf16.vlgmr.msrb.gmra.mxu0 %v3260_v34  ;;  %1329 = vmatmul.bf16.vlgmr.msrb.gmra.mxu1 %v3262_v39  ;;  %v2545_v18 = vld [vmem:[#allocation2 + $0x470] sm:$0xf0]  ;;  %v2420_v21 = vor.u32 %v3006_v15, %v2417_v16  ;;  %v3070_v22 = vld [vmem:[#allocation2 + $0x564] sm:$0xf]  ;;  %v3025_v12 = vld [vmem:[#allocation2 + $0x3f4] sm:$0xf0]  ;;  %v2360_v16 = vor.u32 %v2993_v3, %v2359_v2 }
  0x4a   :  { %1373 = vmatpush.bf16.msra.mxu0 %v2356_v28  ;;  %1386 = vmatpush.bf16.msra.mxu1 %v2484_v29  ;;  %v2673_v23 = vld [vmem:[#allocation2 + $0x570] sm:$0xf0]  ;;  %v2970_v24 = vld [vmem:[#allocation2 + $0x244] sm:$0xf]  ;;  %v2548_v25 = vor.u32 %v3038_v17, %v2545_v18  ;;  %v2231_v14 = vld [vmem:[#allocation2 + $0x1e8] sm:$0xf] }
  0x4b   :  { %1355 = vmatmul.bf16.vlgmr.msrb.gmra.mxu3 %v3240_v57  ;;  %v2273_v26 = vld [vmem:[#allocation2 + $0x250] sm:$0xf0]  ;;  %v3002_v27 = vld [vmem:[#allocation2 + $0x344] sm:$0xf]  ;;  %v2676_v31 = vor.u32 %v3070_v22, %v2673_v23  ;;  %v2961_v15 = vld [vmem:[#allocation2 + $0x1f4] sm:$0xf0] }
  0x4c   :  { %1399 = vmatpush.bf16.msra.mxu3 %v2612_v33  ;;  %1367 = vmatpush.bf16.msra.mxu2 %v2116_v38  ;;  %v2401_v28 = vld [vmem:[#allocation2 + $0x350] sm:$0xf0]  ;;  %v3034_v29 = vld [vmem:[#allocation2 + $0x444] sm:$0xf]  ;;  %v2276_v33 = vor.u32 %v2970_v24, %v2273_v26  ;;  %v2087_v18 = vld [vmem:[#allocation2 + $0xc8] sm:$0xf]  ;;  %v2232_v23 = vor.u32 %v2961_v15, %v2231_v14 }
  0x4d   :  { %v2529_v30 = vld [vmem:[#allocation2 + $0x450] sm:$0xf0]  ;;  %v3066_v32 = vld [vmem:[#allocation2 + $0x544] sm:$0xf]  ;;  %v2404_v35 = vor.u32 %v3002_v27, %v2401_v28  ;;  %v2989_v22 = vld [vmem:[#allocation2 + $0x2d4] sm:$0xf0] }
  0x4e   :  { %1374 = vmatpush.bf16.msra.mxu0 %v2340_v43  ;;  %1387 = vmatpush.bf16.msra.mxu1 %v2468_v44  ;;  %v2657_v36 = vld [vmem:[#allocation2 + $0x550] sm:$0xf0]  ;;  %v2966_v37 = vld [vmem:[#allocation2 + $0x224] sm:$0xf]  ;;  %v2532_v40 = vor.u32 %v3034_v29, %v2529_v30  ;;  %v2471_v24 = vld [vmem:[#allocation2 + $0x3c8] sm:$0xf] }
  0x4f   :  { %1368 = vmatmul.bf16.vlgmr.msra.gmra.mxu2 %v3246_v9  ;;  %v2257_v38 = vld [vmem:[#allocation2 + $0x230] sm:$0xf0]  ;;  %v2998_v41 = vld [vmem:[#allocation2 + $0x324] sm:$0xf]  ;;  %v2660_v45 = vor.u32 %v3066_v32, %v2657_v36  ;;  %v2215_v27 = vld [vmem:[#allocation2 + $0x1c8] sm:$0xf] }
  0x50   :  { %1412 = vmatpush.bf16.msrb.mxu2 %v2740_v42  ;;  %1400 = vmatpush.bf16.msra.mxu3 %v2596_v49  ;;  %v2385_v42 = vld [vmem:[#allocation2 + $0x330] sm:$0xf0]  ;;  %v3030_v43 = vld [vmem:[#allocation2 + $0x424] sm:$0xf]  ;;  %v2260_v49 = vor.u32 %v2966_v37, %v2257_v38  ;;  %v2957_v28 = vld [vmem:[#allocation2 + $0x1d4] sm:$0xf0] }
  0x51   :  { %v2513_v44 = vld [vmem:[#allocation2 + $0x430] sm:$0xf0]  ;;  %v3062_v46 = vld [vmem:[#allocation2 + $0x524] sm:$0xf]  ;;  %v2388_v50 = vor.u32 %v2998_v41, %v2385_v42  ;;  %v2071_v30 = vld [vmem:[#allocation2 + $0xa8] sm:$0xf]  ;;  %v2216_v36 = vor.u32 %v2957_v28, %v2215_v27 }
  0x52   :  { %1375 = vmatpush.bf16.msra.mxu0 %v2324_v58  ;;  %1388 = vmatpush.bf16.msra.mxu1 %v2452_v59  ;;  %v2641_v47 = vld [vmem:[#allocation2 + $0x530] sm:$0xf0]  ;;  %v2962_v51 = vld [vmem:[#allocation2 + $0x204] sm:$0xf]  ;;  %v2516_v55 = vor.u32 %v3030_v43, %v2513_v44  ;;  %v2455_v37 = vld [vmem:[#allocation2 + $0x3a8] sm:$0xf] }
  0x53   :  { %v2241_v52 = vld [vmem:[#allocation2 + $0x210] sm:$0xf0]  ;;  %v2994_v54 = vld [vmem:[#allocation2 + $0x304] sm:$0xf]  ;;  %v3017_v38 = vld [vmem:[#allocation2 + $0x3b4] sm:$0xf0] }
  0x54   :  { %1413 = vmatpush.bf16.msrb.mxu2 %v2724_v56  ;;  %1401 = vmatpush.bf16.msra.mxu3 %v2580_v0  ;;  %v2369_v56 = vld [vmem:[#allocation2 + $0x310] sm:$0xf0]  ;;  %v3026_v58 = vld [vmem:[#allocation2 + $0x404] sm:$0xf]  ;;  %v2644_v0 = vor.u32 %v3062_v46, %v2641_v47  ;;  %v2244_v4 = vor.u32 %v2962_v51, %v2241_v52  ;;  %v2199_v41 = vld [vmem:[#allocation2 + $0x1a8] sm:$0xf]  ;;  %v2456_v46 = vor.u32 %v3017_v38, %v2455_v37 }
  0x55   :  { %v2497_v59 = vld [vmem:[#allocation2 + $0x410] sm:$0xf0]  ;;  %v3090_v63 = vld [vmem:[#allocation2 + $0x604] sm:$0xf]  ;;  %v2372_v5 = vor.u32 %v2994_v54, %v2369_v56  ;;  %v2953_v42 = vld [vmem:[#allocation2 + $0x1b4] sm:$0xf0] }
  0x56   :  { %1376 = vmatpush.bf16.msra.mxu0 %v2308_v7  ;;  %1389 = vmatpush.bf16.msra.mxu1 %v2436_v8  ;;  %v2753_v1 = vld [vmem:[#allocation2 + $0x610] sm:$0xf0]  ;;  %v2500_v8 = vor.u32 %v3026_v58, %v2497_v59  ;;  %v2055_v44 = vld [vmem:[#allocation2 + $0x88] sm:$0xf]  ;;  %v3013_v52 = vld [vmem:[#allocation2 + $0x394] sm:$0xf0] }
  0x57   :  { %v2625_v7 = vld [vmem:[#allocation2 + $0x510] sm:$0xf0]  ;;  %v2311_v47 = vld [vmem:[#allocation2 + $0x288] sm:$0xf]  ;;  %v2949_v56 = vld [vmem:[#allocation2 + $0x194] sm:$0xf0] }
  0x58   :  { %1414 = vmatpush.bf16.msrb.mxu2 %v2708_v6  ;;  %1402 = vmatpush.bf16.msra.mxu3 %v2564_v13  ;;  %v3058_v6 = vld [vmem:[#allocation2 + $0x504] sm:$0xf]  ;;  %v2756_v13 = vor.u32 %v3090_v63, %v2753_v1  ;;  %v2439_v51 = vld [vmem:[#allocation2 + $0x388] sm:$0xf]  ;;  %v2913_v61 = vld [vmem:[#allocation2 + $0x74] sm:$0xf0] }
  0x59   :  { %v2628_v17 = vor.u32 %v3058_v6, %v2625_v7  ;;  %v2039_v59 = vld [vmem:[#allocation2 + $0x68] sm:$0xf]  ;;  %v2440_v62 = vor.u32 %v3013_v52, %v2439_v51  ;;  %v3009_v3 = vld [vmem:[#allocation2 + $0x374] sm:$0xf0]  ;;  %v2927_v51 = vld [vmem:[#allocation2 + $0xec] sm:$0xf] }
  0x5a   :  { %1377 = vmatpush.bf16.msra.mxu0 %v2292_v20  ;;  %1390 = vmatpush.bf16.msra.mxu1 %v2420_v21  ;;  %v2488_v20 = vor.u32 %v3025_v12, %v2487_v11  ;;  %v2343_v21 = vld [vmem:[#allocation2 + $0x2c8] sm:$0xf]  ;;  %v2945_v6 = vld [vmem:[#allocation2 + $0x174] sm:$0xf0]  ;;  %v2105_v52 = vld [vmem:[#allocation2 + $0xf8] sm:$0xf0] }
  0x5b   :  { %v2344_v29 = vor.u32 %v2989_v22, %v2343_v21  ;;  %v2295_v63 = vld [vmem:[#allocation2 + $0x268] sm:$0xf]  ;;  %v2905_v22 = vld [vmem:[#allocation2 + $0x34] sm:$0xf0] }
  0x5c   :  { %1415 = vmatpush.bf16.msrb.mxu2 %v2692_v19  ;;  %1403 = vmatpush.bf16.msra.mxu3 %v2548_v25  ;;  %v2925_v19 = vld [vmem:[#allocation2 + $0xd4] sm:$0xf0]  ;;  %v2423_v2 = vld [vmem:[#allocation2 + $0x368] sm:$0xf] }
  0x5d   :  { %v3021_v25 = vld [vmem:[#allocation2 + $0x3d4] sm:$0xf0]  ;;  %v2088_v26 = vor.u32 %v2925_v19, %v2087_v18  ;;  %v2424_v11 = vor.u32 %v3009_v3, %v2423_v2  ;;  %v2279_v12 = vld [vmem:[#allocation2 + $0x248] sm:$0xf]  ;;  %v2108_v3 = vor.u32 %v2927_v51, %v2105_v52 }
  0x5e   :  { %1378 = vmatpush.bf16.msra.mxu0 %v2276_v33  ;;  %1391 = vmatpush.bf16.msra.mxu1 %v2404_v35  ;;  %v2472_v32 = vor.u32 %v3021_v25, %v2471_v24  ;;  %v2327_v33 = vld [vmem:[#allocation2 + $0x2a8] sm:$0xf]  ;;  %v2985_v35 = vld [vmem:[#allocation2 + $0x2b4] sm:$0xf0] }
  0x5f   :  { %v2328_v43 = vor.u32 %v2985_v35, %v2327_v33  ;;  %v2407_v15 = vld [vmem:[#allocation2 + $0x348] sm:$0xf]  ;;  %v2941_v19 = vld [vmem:[#allocation2 + $0x154] sm:$0xf0] }
  0x60   :  { %1416 = vmatpush.bf16.msrb.mxu2 %v2676_v31  ;;  %1404 = vmatpush.bf16.msra.mxu3 %v2532_v40  ;;  %v2921_v31 = vld [vmem:[#allocation2 + $0xb4] sm:$0xf0]  ;;  %v2151_v18 = vld [vmem:[#allocation2 + $0x148] sm:$0xf] }
  0x61   :  { %v2072_v40 = vor.u32 %v2921_v31, %v2071_v30  ;;  %v2007_v21 = vld [vmem:[#allocation2 + $0x28] sm:$0xf]  ;;  %v2969_v25 = vld [vmem:[#allocation2 + $0x234] sm:$0xf0] }
  0x62   :  { %1379 = vmatpush.bf16.msra.mxu0 %v2260_v49  ;;  %1392 = vmatpush.bf16.msra.mxu1 %v2388_v50  ;;  %v2981_v49 = vld [vmem:[#allocation2 + $0x294] sm:$0xf0]  ;;  %v2200_v50 = vor.u32 %v2953_v42, %v2199_v41  ;;  %v2263_v24 = vld [vmem:[#allocation2 + $0x228] sm:$0xf] }
  0x63   :  { %v2312_v58 = vor.u32 %v2981_v49, %v2311_v47  ;;  %v2391_v27 = vld [vmem:[#allocation2 + $0x328] sm:$0xf]  ;;  %v3001_v28 = vld [vmem:[#allocation2 + $0x334] sm:$0xf0]  ;;  %v2264_v33 = vor.u32 %v2969_v25, %v2263_v24 }
  0x64   :  { %1417 = vmatpush.bf16.msrb.mxu2 %v2660_v45  ;;  %1405 = vmatpush.bf16.msra.mxu3 %v2516_v55  ;;  %v2917_v45 = vld [vmem:[#allocation2 + $0x94] sm:$0xf0]  ;;  %v2183_v55 = vld [vmem:[#allocation2 + $0x188] sm:$0xf]  ;;  %v2392_v38 = vor.u32 %v3001_v28, %v2391_v27  ;;  %v2201_v27 = vld [vmem:[#allocation2 + $0x1b8] sm:$0xf0] }
  0x65   :  { %v2056_v54 = vor.u32 %v2917_v45, %v2055_v44  ;;  %v2184_v1 = vor.u32 %v2949_v56, %v2183_v55  ;;  %v2135_v30 = vld [vmem:[#allocation2 + $0x128] sm:$0xf]  ;;  %v2937_v31 = vld [vmem:[#allocation2 + $0x134] sm:$0xf0] }
  0x66   :  { %1380 = vmatpush.bf16.msra.mxu0 %v2244_v4  ;;  %1393 = vmatpush.bf16.msra.mxu1 %v2372_v5  ;;  %v2040_v4 = vor.u32 %v2913_v61, %v2039_v59  ;;  %v2167_v5 = vld [vmem:[#allocation2 + $0x168] sm:$0xf]  ;;  %v2901_v35 = vld [vmem:[#allocation2 + $0x14] sm:$0xf0]  ;;  %v2136_v44 = vor.u32 %v2937_v31, %v2135_v30  ;;  %v2915_v30 = vld [vmem:[#allocation2 + $0x8c] sm:$0xf] }
  0x67   :  { %v2168_v14 = vor.u32 %v2945_v6, %v2167_v5  ;;  %v3057_v37 = vld [vmem:[#allocation2 + $0x4f4] sm:$0xf0]  ;;  %v2247_v41 = vld [vmem:[#allocation2 + $0x208] sm:$0xf]  ;;  %v2923_v5 = vld [vmem:[#allocation2 + $0xcc] sm:$0xf] }
  0x68   :  { %1418 = vmatpush.bf16.msrb.mxu2 %v2644_v0  ;;  %1406 = vmatpush.bf16.msra.mxu3 %v2500_v8  ;;  %v2977_v0 = vld [vmem:[#allocation2 + $0x274] sm:$0xf0]  ;;  %v2023_v8 = vld [vmem:[#allocation2 + $0x48] sm:$0xf]  ;;  %v2089_v6 = vld [vmem:[#allocation2 + $0xd8] sm:$0xf0] }
  0x69   :  { %1381 = vmatmul.bf16.vlgmr.msra.gmra.mxu0 %v3238_v53  ;;  %1394 = vmatmul.bf16.vlgmr.msra.gmra.mxu1 %v3242_v60  ;;  %v2296_v7 = vor.u32 %v2977_v0, %v2295_v63  ;;  %v2965_v42 = vld [vmem:[#allocation2 + $0x214] sm:$0xf0]  ;;  %v2743_v56 = vld [vmem:[#allocation2 + $0x5e8] sm:$0xf]  ;;  %v2959_v0 = vld [vmem:[#allocation2 + $0x1ec] sm:$0xf] }
  0x6a   :  { %1438 = vmatpush.bf16.msrb.mxu1 %v2104_v10  ;;  %1464 = vmatpush.bf16.msrb.mxu0 %v2360_v16  ;;  %v2909_v10 = vld [vmem:[#allocation2 + $0x54] sm:$0xf0]  ;;  %v2248_v55 = vor.u32 %v2965_v42, %v2247_v41  ;;  %v2599_v59 = vld [vmem:[#allocation2 + $0x4c8] sm:$0xf]  ;;  %v2057_v31 = vld [vmem:[#allocation2 + $0x98] sm:$0xf0] }
  0x6b   :  { %1407 = vmatmul.bf16.vlgmr.msra.gmra.mxu3 %v3260_v34  ;;  %v3005_v16 = vld [vmem:[#allocation2 + $0x354] sm:$0xf0]  ;;  %v2567_v24 = vld [vmem:[#allocation2 + $0x488] sm:$0xf]  ;;  %v2185_v41 = vld [vmem:[#allocation2 + $0x198] sm:$0xf0]  ;;  %v2060_v42 = vor.u32 %v2915_v30, %v2057_v31 }
  0x6c   :  { %1432 = vmatpush.bf16.msrb.mxu3 %v2756_v13  ;;  %1419 = vmatpush.bf16.msrb.mxu2 %v2628_v17  ;;  %v2973_v13 = vld [vmem:[#allocation2 + $0x254] sm:$0xf0]  ;;  %v2024_v17 = vor.u32 %v2909_v10, %v2023_v8  ;;  %v2727_v10 = vld [vmem:[#allocation2 + $0x5c8] sm:$0xf]  ;;  %v2489_v30 = vld [vmem:[#allocation2 + $0x3f8] sm:$0xf0] }
  0x6d   :  { %v2997_v45 = vld [vmem:[#allocation2 + $0x314] sm:$0xf0]  ;;  %v2535_v51 = vld [vmem:[#allocation2 + $0x448] sm:$0xf] }
  0x6e   :  { %1439 = vmatpush.bf16.msrb.mxu1 %v2088_v26  ;;  %1465 = vmatpush.bf16.msrb.mxu0 %v2344_v29  ;;  %v2152_v26 = vor.u32 %v2941_v19, %v2151_v18  ;;  %v2008_v29 = vor.u32 %v2905_v22, %v2007_v21  ;;  %v3093_v47 = vld [vmem:[#allocation2 + $0x614] sm:$0xf0]  ;;  %v2919_v18 = vld [vmem:[#allocation2 + $0xac] sm:$0xf]  ;;  %v2073_v19 = vld [vmem:[#allocation2 + $0xb8] sm:$0xf0] }
  0x6f   :  { %1420 = vmatmul.bf16.vlgmr.msrb.gmra.mxu2 %v3262_v39  ;;  %v2711_v22 = vld [vmem:[#allocation2 + $0x5a8] sm:$0xf]  ;;  %v3045_v25 = vld [vmem:[#allocation2 + $0x494] sm:$0xf0]  ;;  %v2076_v28 = vor.u32 %v2919_v18, %v2073_v19  ;;  %v2137_v18 = vld [vmem:[#allocation2 + $0x138] sm:$0xf0] }
  0x70   :  { %1477 = vmatpush.bf16.msra.mxu2 %v2488_v20  ;;  %1451 = vmatpush.bf16.msra.mxu3 %v2232_v23  ;;  %v2280_v20 = vor.u32 %v2973_v13, %v2279_v12  ;;  %v2408_v23 = vor.u32 %v3005_v16, %v2407_v15  ;;  %v2583_v12 = vld [vmem:[#allocation2 + $0x4a8] sm:$0xf]  ;;  %v3049_v13 = vld [vmem:[#allocation2 + $0x4b4] sm:$0xf0]  ;;  %v2217_v15 = vld [vmem:[#allocation2 + $0x1d8] sm:$0xf0]  ;;  %v2092_v16 = vor.u32 %v2923_v5, %v2089_v6 }
  0x71   :  { %v3037_v52 = vld [vmem:[#allocation2 + $0x454] sm:$0xf0]  ;;  %v2153_v5 = vld [vmem:[#allocation2 + $0x158] sm:$0xf0] }
  0x72   :  { %1440 = vmatpush.bf16.msrb.mxu1 %v2072_v40  ;;  %1466 = vmatpush.bf16.msrb.mxu0 %v2328_v43  ;;  %v2119_v40 = vld [vmem:[#allocation2 + $0x108] sm:$0xf] }
  0x73   :  { %v2375_v43 = vld [vmem:[#allocation2 + $0x308] sm:$0xf] }
  0x74   :  { %1478 = vmatpush.bf16.msra.mxu2 %v2472_v32  ;;  %1452 = vmatpush.bf16.msra.mxu3 %v2216_v36  ;;  %v1991_v32 = vld [vmem:[#allocation2 + $0x8] sm:$0xf]  ;;  %v2376_v61 = vor.u32 %v2997_v45, %v2375_v43  ;;  %v2041_v45 = vld [vmem:[#allocation2 + $0x78] sm:$0xf0] }
  0x75   :  { %v2615_v36 = vld [vmem:[#allocation2 + $0x4e8] sm:$0xf]  ;;  %v1992_v49 = vor.u32 %v2901_v35, %v1991_v32  ;;  %v2568_v32 = vor.u32 %v3045_v25, %v2567_v24  ;;  %v2899_v24 = vld [vmem:[#allocation2 + $0xc] sm:$0xf]  ;;  %v1993_v25 = vld [vmem:[#allocation2 + $0x18] sm:$0xf0] }
  0x76   :  { %1441 = vmatpush.bf16.msrb.mxu1 %v2056_v54  ;;  %1467 = vmatpush.bf16.msrb.mxu0 %v2312_v58  ;;  %v2616_v54 = vor.u32 %v3057_v37, %v2615_v36  ;;  %v3089_v58 = vld [vmem:[#allocation2 + $0x5f4] sm:$0xf0]  ;;  %v2695_v35 = vld [vmem:[#allocation2 + $0x588] sm:$0xf] }
  0x77   :  { %v3077_v36 = vld [vmem:[#allocation2 + $0x594] sm:$0xf0]  ;;  %v2551_v37 = vld [vmem:[#allocation2 + $0x468] sm:$0xf] }
  0x78   :  { %1479 = vmatpush.bf16.msra.mxu2 %v2456_v46  ;;  %1453 = vmatpush.bf16.msra.mxu3 %v2200_v50  ;;  %v2759_v46 = vld [vmem:[#allocation2 + $0x608] sm:$0xf]  ;;  %v2933_v50 = vld [vmem:[#allocation2 + $0x114] sm:$0xf0]  ;;  %v2696_v43 = vor.u32 %v3077_v36, %v2695_v35  ;;  %v2987_v35 = vld [vmem:[#allocation2 + $0x2cc] sm:$0xf]  ;;  %v1996_v36 = vor.u32 %v2899_v24, %v1993_v25 }
  0x79   :  { %v2760_v63 = vor.u32 %v3093_v47, %v2759_v46  ;;  %v2120_v2 = vor.u32 %v2933_v50, %v2119_v40  ;;  %v2947_v40 = vld [vmem:[#allocation2 + $0x18c] sm:$0xf]  ;;  %v3073_v50 = vld [vmem:[#allocation2 + $0x574] sm:$0xf0] }
  0x7a   :  { %1442 = vmatpush.bf16.msrb.mxu1 %v2040_v4  ;;  %1468 = vmatpush.bf16.msrb.mxu0 %v2296_v7  ;;  %v2744_v4 = vor.u32 %v3089_v58, %v2743_v56  ;;  %v2188_v47 = vor.u32 %v2947_v40, %v2185_v41  ;;  %v2121_v40 = vld [vmem:[#allocation2 + $0x118] sm:$0xf0]  ;;  %v3007_v24 = vld [vmem:[#allocation2 + $0x36c] sm:$0xf] }
  0x7b   :  { %2766 = vmatmul.msk.bf16.vlgmr.msrb.gmra.mxu3 %vm1252_vm0, %v3253_v48 }
  0x7c   :  { %1480 = vmatpush.bf16.msra.mxu2 %v2440_v62  ;;  %1454 = vmatpush.bf16.msra.mxu3 %v2184_v1  ;;  %v3053_v62 = vld [vmem:[#allocation2 + $0x4d4] sm:$0xf0]  ;;  %v2233_v1 = vld [vmem:[#allocation2 + $0x1f8] sm:$0xf0] }
  0x7d   :  { %v2600_v7 = vor.u32 %v3053_v62, %v2599_v59  ;;  %v2236_v8 = vor.u32 %v2959_v0, %v2233_v1  ;;  %v2907_v59 = vld [vmem:[#allocation2 + $0x4c] sm:$0xf]  ;;  %v2536_v62 = vor.u32 %v3037_v52, %v2535_v51  ;;  %v2663_v0 = vld [vmem:[#allocation2 + $0x548] sm:$0xf]  ;;  %v3069_v1 = vld [vmem:[#allocation2 + $0x554] sm:$0xf0] }
  0x7e   :  { %1443 = vmatpush.bf16.msrb.mxu1 %v2024_v17  ;;  %1469 = vmatpush.bf16.msrb.mxu0 %v2280_v20  ;;  %v2584_v20 = vor.u32 %v3049_v13, %v2583_v12  ;;  %v2647_v13 = vld [vmem:[#allocation2 + $0x528] sm:$0xf]  ;;  %v3051_v51 = vld [vmem:[#allocation2 + $0x4cc] sm:$0xf]  ;;  %v2601_v52 = vld [vmem:[#allocation2 + $0x4d8] sm:$0xf0] }
  0x80   :  { %1481 = vmatpush.bf16.msra.mxu2 %v2424_v11  ;;  %1455 = vmatpush.bf16.msra.mxu3 %v2168_v14  ;;  %v3085_v11 = vld [vmem:[#allocation2 + $0x5d4] sm:$0xf0]  ;;  %v2955_v14 = vld [vmem:[#allocation2 + $0x1cc] sm:$0xf] }
  0x81   :  { %v2728_v17 = vor.u32 %v3085_v11, %v2727_v10  ;;  %v2220_v21 = vor.u32 %v2955_v14, %v2217_v15  ;;  %v2009_v10 = vld [vmem:[#allocation2 + $0x38] sm:$0xf0]  ;;  %v3065_v14 = vld [vmem:[#allocation2 + $0x534] sm:$0xf0]  ;;  %v2503_v15 = vld [vmem:[#allocation2 + $0x408] sm:$0xf] }
  0x82   :  { %1444 = vmatpush.bf16.msrb.mxu1 %v2008_v29  ;;  %1470 = vmatpush.bf16.msrb.mxu0 %v2264_v33 }
  0x84   :  { %1482 = vmatpush.bf16.msra.mxu2 %v2408_v23  ;;  %1456 = vmatpush.bf16.msra.mxu3 %v2152_v26  ;;  %v3081_v23 = vld [vmem:[#allocation2 + $0x5b4] sm:$0xf0]  ;;  %v2951_v26 = vld [vmem:[#allocation2 + $0x1ac] sm:$0xf] }
  0x85   :  { %v2712_v29 = vor.u32 %v3081_v23, %v2711_v22  ;;  %v2204_v33 = vor.u32 %v2951_v26, %v2201_v27  ;;  %v2648_v22 = vor.u32 %v3065_v14, %v2647_v13  ;;  %v2631_v23 = vld [vmem:[#allocation2 + $0x508] sm:$0xf]  ;;  %v2441_v14 = vld [vmem:[#allocation2 + $0x398] sm:$0xf0] }
  0x86   :  { %1445 = vmatpush.bf16.msrb.mxu1 %v1992_v49  ;;  %1471 = vmatpush.bf16.msrb.mxu0 %v2248_v55  ;;  %v2679_v49 = vld [vmem:[#allocation2 + $0x568] sm:$0xf]  ;;  %v2169_v55 = vld [vmem:[#allocation2 + $0x178] sm:$0xf0] }
  0x87   :  { %v2680_v58 = vor.u32 %v3073_v50, %v2679_v49  ;;  %v2473_v50 = vld [vmem:[#allocation2 + $0x3d8] sm:$0xf0] }
  0x88   :  { %1483 = vmatpush.bf16.msra.mxu2 %v2392_v38  ;;  %1457 = vmatpush.bf16.msra.mxu3 %v2136_v44  ;;  %v3041_v38 = vld [vmem:[#allocation2 + $0x474] sm:$0xf0]  ;;  %v2911_v44 = vld [vmem:[#allocation2 + $0x6c] sm:$0xf] }
  0x89   :  { %1472 = vmatmul.bf16.vlgmr.msrb.gmra.mxu0 %v3238_v53  ;;  %1446 = vmatmul.bf16.vlgmr.msrb.gmra.mxu1 %v3240_v57  ;;  %v2552_v46 = vor.u32 %v3041_v38, %v2551_v37  ;;  %v2044_v56 = vor.u32 %v2911_v44, %v2041_v45  ;;  %v2345_v37 = vld [vmem:[#allocation2 + $0x2d8] sm:$0xf0]  ;;  %v2931_v38 = vld [vmem:[#allocation2 + $0x10c] sm:$0xf] }
  0x8a   :  { %1490 = vmatpush.bf16.msra.mxu1 %v2616_v54  ;;  %1523 = vmatpush.bf16.msra.mxu0 %v2760_v63  ;;  %v2943_v54 = vld [vmem:[#allocation2 + $0x16c] sm:$0xf]  ;;  %v2124_v49 = vor.u32 %v2931_v38, %v2121_v40 }
  0x8b   :  { %v2172_v63 = vor.u32 %v2943_v54, %v2169_v55  ;;  %v2983_v55 = vld [vmem:[#allocation2 + $0x2ac] sm:$0xf] }
  0x8c   :  { %1484 = vmatpush.bf16.msra.mxu2 %v2376_v61  ;;  %1458 = vmatpush.bf16.msra.mxu3 %v2120_v2  ;;  %v2025_v61 = vld [vmem:[#allocation2 + $0x58] sm:$0xf0]  ;;  %v2519_v2 = vld [vmem:[#allocation2 + $0x428] sm:$0xf]  ;;  %v3003_v38 = vld [vmem:[#allocation2 + $0x34c] sm:$0xf] }
  0x8d   :  { %v2028_v6 = vor.u32 %v2907_v59, %v2025_v61  ;;  %v2729_v59 = vld [vmem:[#allocation2 + $0x5d8] sm:$0xf0] }
  0x8e   :  { %1491 = vmatpush.bf16.msra.mxu1 %v2600_v7  ;;  %1542 = vmatpush.bf16.msrb.mxu0 %v2236_v8  ;;  %v2664_v7 = vor.u32 %v3069_v1, %v2663_v0  ;;  %v2903_v8 = vld [vmem:[#allocation2 + $0x2c] sm:$0xf]  ;;  %v2457_v1 = vld [vmem:[#allocation2 + $0x3b8] sm:$0xf0] }
  0x8f   :  { %1459 = vmatmul.bf16.vlgmr.msra.gmra.mxu3 %v3246_v9  ;;  %1485 = vmatmul.bf16.vlgmr.msra.gmra.mxu2 %v3242_v60  ;;  %v2012_v19 = vor.u32 %v2903_v8, %v2009_v10  ;;  %v2713_v8 = vld [vmem:[#allocation2 + $0x5b8] sm:$0xf0] }
  0x90   :  { %1529 = vmatpush.bf16.msrb.mxu2 %v2108_v3  ;;  %1503 = vmatpush.bf16.msrb.mxu3 %v2744_v4  ;;  %v3033_v3 = vld [vmem:[#allocation2 + $0x434] sm:$0xf0]  ;;  %v2939_v4 = vld [vmem:[#allocation2 + $0x14c] sm:$0xf] }
  0x91   :  { %v2520_v11 = vor.u32 %v3033_v3, %v2519_v2  ;;  %v2156_v12 = vor.u32 %v2939_v4, %v2153_v5  ;;  %v3047_v2 = vld [vmem:[#allocation2 + $0x4ac] sm:$0xf]  ;;  %v2585_v3 = vld [vmem:[#allocation2 + $0x4b8] sm:$0xf0] }
  0x92   :  { %1492 = vmatpush.bf16.msra.mxu1 %v2584_v20  ;;  %1543 = vmatpush.bf16.msrb.mxu0 %v2220_v21  ;;  %v2991_v20 = vld [vmem:[#allocation2 + $0x2ec] sm:$0xf]  ;;  %v2361_v21 = vld [vmem:[#allocation2 + $0x2f8] sm:$0xf0] }
  0x93   :  { %v2364_v31 = vor.u32 %v2991_v20, %v2361_v21  ;;  %v2979_v5 = vld [vmem:[#allocation2 + $0x28c] sm:$0xf]  ;;  %v2697_v21 = vld [vmem:[#allocation2 + $0x598] sm:$0xf0] }
  0x94   :  { %1530 = vmatpush.bf16.msrb.mxu2 %v2092_v16  ;;  %1504 = vmatpush.bf16.msrb.mxu3 %v2728_v17  ;;  %v3029_v16 = vld [vmem:[#allocation2 + $0x414] sm:$0xf0]  ;;  %v2935_v17 = vld [vmem:[#allocation2 + $0x12c] sm:$0xf] }
  0x95   :  { %v2504_v26 = vor.u32 %v3029_v16, %v2503_v15  ;;  %v2140_v27 = vor.u32 %v2935_v17, %v2137_v18  ;;  %v3043_v15 = vld [vmem:[#allocation2 + $0x48c] sm:$0xf]  ;;  %v2569_v16 = vld [vmem:[#allocation2 + $0x498] sm:$0xf0] }
  0x96   :  { %1493 = vmatpush.bf16.msra.mxu1 %v2568_v32  ;;  %1544 = vmatpush.bf16.msrb.mxu0 %v2204_v33  ;;  %v3055_v32 = vld [vmem:[#allocation2 + $0x4ec] sm:$0xf]  ;;  %v2617_v33 = vld [vmem:[#allocation2 + $0x4f8] sm:$0xf0] }
  0x97   :  { %v2620_v45 = vor.u32 %v3055_v32, %v2617_v33  ;;  %v2975_v18 = vld [vmem:[#allocation2 + $0x26c] sm:$0xf]  ;;  %v2681_v33 = vld [vmem:[#allocation2 + $0x578] sm:$0xf0] }
  0x98   :  { %1531 = vmatpush.bf16.msrb.mxu2 %v2076_v28  ;;  %1505 = vmatpush.bf16.msrb.mxu3 %v2712_v29  ;;  %v3061_v28 = vld [vmem:[#allocation2 + $0x514] sm:$0xf0]  ;;  %v3023_v29 = vld [vmem:[#allocation2 + $0x3ec] sm:$0xf] }
  0x99   :  { %2767 = vmatmul.msk.bf16.vlgmr.msra.gmra.mxu0 %vm1252_vm0, %v3253_v48  ;;  %v2632_v41 = vor.u32 %v3061_v28, %v2631_v23  ;;  %v2492_v44 = vor.u32 %v3023_v29, %v2489_v30  ;;  %v2572_v23 = vor.u32 %v3043_v15, %v2569_v16  ;;  %v2553_v28 = vld [vmem:[#allocation2 + $0x478] sm:$0xf0]  ;;  %v2971_v30 = vld [vmem:[#allocation2 + $0x24c] sm:$0xf] }
  0x9a   :  { %1494 = vmatpush.bf16.msra.mxu1 %v2552_v46  ;;  %1545 = vmatpush.bf16.msrb.mxu0 %v2188_v47  ;;  %v3019_v46 = vld [vmem:[#allocation2 + $0x3cc] sm:$0xf]  ;;  %v2348_v47 = vor.u32 %v2987_v35, %v2345_v37 }
  0x9b   :  { %v2476_v61 = vor.u32 %v3019_v46, %v2473_v50  ;;  %v3071_v32 = vld [vmem:[#allocation2 + $0x56c] sm:$0xf] }
  0x9c   :  { %1532 = vmatpush.bf16.msrb.mxu2 %v2060_v42  ;;  %1506 = vmatpush.bf16.msrb.mxu3 %v2696_v43  ;;  %v3087_v42 = vld [vmem:[#allocation2 + $0x5ec] sm:$0xf]  ;;  %v2745_v43 = vld [vmem:[#allocation2 + $0x5f8] sm:$0xf0] }
  0x9d   :  { %v2748_v54 = vor.u32 %v3087_v42, %v2745_v43  ;;  %v2409_v42 = vld [vmem:[#allocation2 + $0x358] sm:$0xf0]  ;;  %v3035_v43 = vld [vmem:[#allocation2 + $0x44c] sm:$0xf] }
  0x9e   :  { %1495 = vmatpush.bf16.msra.mxu1 %v2536_v62  ;;  %1546 = vmatpush.bf16.msrb.mxu0 %v2172_v63  ;;  %v2604_v62 = vor.u32 %v3051_v51, %v2601_v52  ;;  %v3015_v63 = vld [vmem:[#allocation2 + $0x3ac] sm:$0xf]  ;;  %v2665_v51 = vld [vmem:[#allocation2 + $0x558] sm:$0xf0]  ;;  %v2412_v52 = vor.u32 %v3003_v38, %v2409_v42 }
  0x9f   :  { %v2460_v10 = vor.u32 %v3015_v63, %v2457_v1  ;;  %v2967_v46 = vld [vmem:[#allocation2 + $0x22c] sm:$0xf] }
  0xa0   :  { %1533 = vmatpush.bf16.msrb.mxu2 %v2044_v56  ;;  %1507 = vmatpush.bf16.msrb.mxu3 %v2680_v58  ;;  %v2329_v56 = vld [vmem:[#allocation2 + $0x2b8] sm:$0xf0]  ;;  %v3083_v58 = vld [vmem:[#allocation2 + $0x5cc] sm:$0xf] }
  0xa1   :  { %v2332_v0 = vor.u32 %v2983_v55, %v2329_v56  ;;  %v2732_v4 = vor.u32 %v3083_v58, %v2729_v59  ;;  %v3067_v50 = vld [vmem:[#allocation2 + $0x54c] sm:$0xf]  ;;  %v2393_v58 = vld [vmem:[#allocation2 + $0x338] sm:$0xf0] }
  0xa2   :  { %1496 = vmatpush.bf16.msra.mxu1 %v2520_v11  ;;  %1547 = vmatpush.bf16.msrb.mxu0 %v2156_v12  ;;  %v2588_v11 = vor.u32 %v3047_v2, %v2585_v3  ;;  %v3011_v12 = vld [vmem:[#allocation2 + $0x38c] sm:$0xf]  ;;  %v2649_v3 = vld [vmem:[#allocation2 + $0x538] sm:$0xf0] }
  0xa3   :  { %v2999_v55 = vld [vmem:[#allocation2 + $0x32c] sm:$0xf] }
  0xa4   :  { %1534 = vmatpush.bf16.msrb.mxu2 %v2028_v6  ;;  %1508 = vmatpush.bf16.msrb.mxu3 %v2664_v7  ;;  %v2313_v6 = vld [vmem:[#allocation2 + $0x298] sm:$0xf0]  ;;  %v3079_v7 = vld [vmem:[#allocation2 + $0x5ac] sm:$0xf] }
  0xa5   :  { %v2316_v13 = vor.u32 %v2979_v5, %v2313_v6  ;;  %v2716_v17 = vor.u32 %v3079_v7, %v2713_v8  ;;  %v3031_v59 = vld [vmem:[#allocation2 + $0x42c] sm:$0xf]  ;;  %v2761_v5 = vld [vmem:[#allocation2 + $0x618] sm:$0xf0]  ;;  %v2396_v7 = vor.u32 %v2999_v55, %v2393_v58 }
  0xa6   :  { %1497 = vmatpush.bf16.msra.mxu1 %v2504_v26  ;;  %1548 = vmatpush.bf16.msrb.mxu0 %v2140_v27  ;;  %v2425_v26 = vld [vmem:[#allocation2 + $0x378] sm:$0xf0]  ;;  %v3039_v27 = vld [vmem:[#allocation2 + $0x46c] sm:$0xf] }
  0xa7   :  { %v2556_v37 = vor.u32 %v3039_v27, %v2553_v28  ;;  %v2963_v63 = vld [vmem:[#allocation2 + $0x20c] sm:$0xf]  ;;  %v3109_v28 = vld [vmem:[%s3416_s3 + $0x78] sm:$0xff] }
  0xa8   :  { %1535 = vmatpush.bf16.msrb.mxu2 %v2012_v19  ;;  %1509 = vmatpush.bf16.msrb.mxu3 %v2648_v22  ;;  %v2297_v19 = vld [vmem:[#allocation2 + $0x278] sm:$0xf0]  ;;  %v2444_v22 = vor.u32 %v3011_v12, %v2441_v14  ;;  %v3063_v1 = vld [vmem:[#allocation2 + $0x52c] sm:$0xf] }
  0xa9   :  { %1498 = vmatmul.bf16.vlgmr.msra.gmra.mxu1 %v3260_v34  ;;  %v2300_v25 = vor.u32 %v2975_v18, %v2297_v19  ;;  %v2995_v12 = vld [vmem:[#allocation2 + $0x30c] sm:$0xf]  ;;  %v2652_v15 = vor.u32 %v3063_v1, %v2649_v3 }
  0xaa   :  { %1555 = vmatpush.bf16.msrb.mxu1 %v2364_v31  ;;  %1549 = vmatpush.bf16.msrb.mxu0 %v2124_v49  ;;  %v3284_v20 = vpop.f32.mrf.mxu0  ;;  %v3286_v29 = vpop.f32.mrf.mxu1  ;;  %v2281_v31 = vld [vmem:[#allocation2 + $0x258] sm:$0xf0]  ;;  %v3027_v16 = vld [vmem:[#allocation2 + $0x40c] sm:$0xf] }
  0xab   :  { %v2284_v40 = vor.u32 %v2971_v30, %v2281_v31  ;;  %v3059_v19 = vld [vmem:[#allocation2 + $0x50c] sm:$0xf]  ;;  %v3108_v31 = vld [vmem:[%s3416_s3 + $0x70] sm:$0xff] }
  0xac   :  { %1536 = vmatpush.bf16.msrb.mxu2 %v1996_v36  ;;  %1510 = vmatpush.bf16.msrb.mxu3 %v2632_v41  ;;  %v2428_v36 = vor.u32 %v3007_v24, %v2425_v26  ;;  %v3101_v24 = vld [vmem:[%s3416_s3 + $0x38] sm:$0xff] }
  0xad   :  { %1550 = vmatmul.bf16.vlgmr.msrb.gmra.mxu0 %v3246_v9  ;;  %v3288_v35 = vpop.f32.mrf.mxu2 }
  0xae   :  { %1556 = vmatpush.bf16.msrb.mxu1 %v2348_v47  ;;  %1594 = vmatpush.bf16.msra.mxu0 %v2748_v54  ;;  %v3290_v41 = vpop.f32.mrf.mxu3  ;;  %v2265_v47 = vld [vmem:[#allocation2 + $0x238] sm:$0xf0] }
  0xaf   :  { %1511 = vmatmul.bf16.vlgmr.msrb.gmra.mxu3 %v3262_v39  ;;  %1537 = vmatmul.bf16.vlgmr.msrb.gmra.mxu2 %v3240_v57  ;;  %v3075_v57 = vld [vmem:[#allocation2 + $0x58c] sm:$0xf]  ;;  %v2268_v56 = vor.u32 %v2967_v46, %v2265_v47 }
  0xb0   :  { %1568 = vmatpush.bf16.msra.mxu3 %v2492_v44  ;;  %1581 = vmatpush.bf16.msra.mxu2 %v2620_v45  ;;  %v2700_v9 = vor.u32 %v3075_v57, %v2697_v21  ;;  %v2537_v44 = vld [vmem:[#allocation2 + $0x458] sm:$0xf0]  ;;  %v2684_v45 = vor.u32 %v3071_v32, %v2681_v33  ;;  %v3095_v46 = vld [vmem:[%s3416_s3 + $0x8] sm:$0xff] }
  0xb1   :  { %v2540_v54 = vor.u32 %v3035_v43, %v2537_v44  ;;  %v2633_v57 = vld [vmem:[#allocation2 + $0x518] sm:$0xf0] }
  0xb2   :  { %1557 = vmatpush.bf16.msrb.mxu1 %v2332_v0  ;;  %1595 = vmatpush.bf16.msra.mxu0 %v2732_v4  ;;  %v1267_v49 = vpop.f32.mrf.mxu0  ;;  %v2249_v0 = vld [vmem:[#allocation2 + $0x218] sm:$0xf0]  ;;  %v1280_v2 = vpop.f32.mrf.mxu1  ;;  %v3091_v4 = vld [vmem:[#allocation2 + $0x60c] sm:$0xf] }
  0xb3   :  { %v2764_v18 = vor.u32 %v3091_v4, %v2761_v5  ;;  %v3117_v5 = vld [vmem:[%s3416_s3 + $0xb8] sm:$0xff] }
  0xb4   :  { %1569 = vmatpush.bf16.msra.mxu3 %v2476_v61  ;;  %1582 = vmatpush.bf16.msra.mxu2 %v2604_v62  ;;  %v2521_v61 = vld [vmem:[#allocation2 + $0x438] sm:$0xf0]  ;;  %v2668_v62 = vor.u32 %v3067_v50, %v2665_v51  ;;  %v3094_v50 = vld [vmem:[%s3416_s3] sm:$0xff] }
  0xb5   :  { %v1293_v6 = vpop.f32.mrf.mxu2  ;;  %v2524_v8 = vor.u32 %v3031_v59, %v2521_v61 }
  0xb6   :  { %1558 = vmatpush.bf16.msrb.mxu1 %v2316_v13  ;;  %1596 = vmatpush.bf16.msra.mxu0 %v2716_v17  ;;  %v2377_v13 = vld [vmem:[#allocation2 + $0x318] sm:$0xf0]  ;;  %v1306_v14 = vpop.f32.mrf.mxu3  ;;  %v3116_v6 = vld [vmem:[%s3416_s3 + $0xb0] sm:$0xff] }
  0xb7   :  { %v2505_v17 = vld [vmem:[#allocation2 + $0x418] sm:$0xf0] }
  0xb8   :  { %1570 = vmatpush.bf16.msra.mxu3 %v2460_v10  ;;  %1583 = vmatpush.bf16.msra.mxu2 %v2588_v11  ;;  %v3295_v10 = vld [vmem:[%s3415_s2] sm:$0xf]  ;;  %v2252_v11 = vor.u32 %v2963_v63, %v2249_v0 }
  0xb9   :  { %v240_v21 = vperm.slane %v3295_v10, 0  ;;  %v241_v59 = vperm.slane %v3295_v10, 1 }
  0xba   :  { %1559 = vmatpush.bf16.msrb.mxu1 %v2300_v25  ;;  %1597 = vmatpush.bf16.msra.mxu0 %v2700_v9  ;;  %v2636_v25 = vor.u32 %v3059_v19, %v2633_v57  ;;  %v3100_v9 = vld [vmem:[%s3416_s3 + $0x30] sm:$0xff]  ;;  %v3113_v57 = vld [vmem:[%s3416_s3 + $0x98] sm:$0xff] }
  0xbb   :  { %v1266_v26 = vadd.f32 %v3284_v20, %v240_v21  ;;  %v3112_v21 = vld [vmem:[%s3416_s3 + $0x90] sm:$0xff] }
  0xbc   :  { %1571 = vmatpush.bf16.msra.mxu3 %v2444_v22  ;;  %1584 = vmatpush.bf16.msra.mxu2 %v2572_v23  ;;  %v2380_v22 = vor.u32 %v2995_v12, %v2377_v13  ;;  %v2508_v23 = vor.u32 %v3027_v16, %v2505_v17  ;;  %v3115_v13 = vld [vmem:[%s3416_s3 + $0xa8] sm:$0xff] }
  0xbd   :  { %v1279_v20 = vadd.f32 %v3286_v29, %v1266_v26 }
  0xbe   :  { %1560 = vmatpush.bf16.msrb.mxu1 %v2284_v40  ;;  %1598 = vmatpush.bf16.msra.mxu0 %v2684_v45  ;;  %v1343_v27 = vpop.f32.mrf.mxu2  ;;  %v3106_v40 = vld [vmem:[%s3416_s3 + $0x60] sm:$0xff]  ;;  %v3105_v45 = vld [vmem:[%s3416_s3 + $0x58] sm:$0xff] }
  0xbf   :  { %v1292_v32 = vadd.f32 %v3288_v35, %v1279_v20  ;;  %v3110_v20 = vld [vmem:[%s3416_s3 + $0x80] sm:$0xff] }
  0xc0   :  { %1572 = vmatpush.bf16.msra.mxu3 %v2428_v36  ;;  %1585 = vmatpush.bf16.msra.mxu2 %v2556_v37  ;;  %v3097_v36 = vld [vmem:[%s3416_s3 + $0x18] sm:$0xff] }
  0xc1   :  { %v1305_v29 = vadd.f32 %v3290_v41, %v1292_v32  ;;  %v3096_v41 = vld [vmem:[%s3416_s3 + $0x10] sm:$0xff] }
  0xc2   :  { %1561 = vmatpush.bf16.msrb.mxu1 %v2268_v56  ;;  %1599 = vmatpush.bf16.msra.mxu0 %v2668_v62  ;;  %v3102_v56 = vld [vmem:[%s3416_s3 + $0x40] sm:$0xff]  ;;  %v3124_v32 = vld [vmem:[%s3416_s3 + $0xf0] sm:$0xff] }
  0xc4   :  { %1573 = vmatpush.bf16.msra.mxu3 %v2412_v52  ;;  %1586 = vmatpush.bf16.msra.mxu2 %v2540_v54  ;;  %v3103_v54 = vld [vmem:[%s3416_s3 + $0x48] sm:$0xff] }
  0xc6   :  { %1562 = vmatpush.bf16.msrb.mxu1 %v2252_v11  ;;  %1600 = vmatpush.bf16.msra.mxu0 %v2652_v15  ;;  %v1317_v30 = vpop.f32.mrf.mxu0  ;;  %v1330_v33 = vpop.f32.mrf.mxu1  ;;  %v3114_v15 = vld [vmem:[%s3416_s3 + $0xa0] sm:$0xff] }
  0xc7   :  { %v1318_v35 = vadd.f32 %v1317_v30, %v1305_v29  ;;  %v3123_v29 = vld [vmem:[%s3416_s3 + $0xe8] sm:$0xff] }
  0xc8   :  { %1574 = vmatpush.bf16.msra.mxu3 %v2396_v7  ;;  %1587 = vmatpush.bf16.msra.mxu2 %v2524_v8 }
  0xc9   :  { %1563 = vmatmul.bf16.vlgmr.msrb.gmra.mxu1 %v3238_v53  ;;  %v3099_v53 = vld [vmem:[%s3416_s3 + $0x28] sm:$0xff]  ;;  %v1331_v44 = vadd.f32 %v1330_v33, %v1318_v35  ;;  %v242_v33 = vperm.slane %v3295_v10, 2  ;;  %v3122_v35 = vld [vmem:[%s3416_s3 + $0xe0] sm:$0xff] }
  0xca   :  { %1614 = vmatpush.bf16.msra.mxu1 %v2764_v18  ;;  %1601 = vmatpush.bf16.msra.mxu0 %v2636_v25  ;;  %v3111_v25 = vld [vmem:[%s3416_s3 + $0x88] sm:$0xff] }
  0xcb   :  { %v1344_v47 = vadd.f32 %v1343_v27, %v1331_v44 }
  0xcc   :  { %1575 = vmatpush.bf16.msra.mxu3 %v2380_v22  ;;  %1588 = vmatpush.bf16.msra.mxu2 %v2508_v23 }
  0xcd   :  { %1602 = vmatmul.bf16.vlgmr.msra.gmra.mxu0 %v3262_v39  ;;  %v3107_v39 = vld [vmem:[%s3416_s3 + $0x68] sm:$0xff]  ;;  %v1620_v52 = vmax.f32 %v1344_v47, 0.0 }
  0xce   :  { %1901 = vmatpush.bf16.msrb.mxu1 %v3109_v28  ;;  %v1356_v37 = vpop.f32.mrf.mxu3  ;;  %v1319_v38 = vpop.f32.mrf.mxu0 }
  0xcf   :  { %1576 = vmatmul.bf16.vlgmr.msra.gmra.mxu3 %v3242_v60  ;;  %1589 = vmatmul.bf16.vlgmr.msra.gmra.mxu2 %v3260_v34  ;;  %v1345_v60 = vpop.f32.mrf.mxu2  ;;  %v3098_v34 = vld [vmem:[%s3416_s3 + $0x20] sm:$0xff]  ;;  %v1332_v42 = vpop.f32.mrf.mxu1  ;;  %v1624_v55 = vpack.c.bf16 %v1620_v52, %v1620_v52  ;;  %v1357_v62 = vadd.f32 %v1356_v37, %v241_v59  ;;  %v243_v59 = vperm.slane %v3295_v10, 3 }
  0xd0   :  { %1888 = vmatpush.bf16.msrb.mxu3 %v3101_v24  ;;  %1914 = vmatpush.bf16.msrb.mxu2 %v3117_v5 }
  0xd2   :  { %1902 = vmatpush.bf16.msrb.mxu1 %v3108_v31 }
  0xd4   :  { %1889 = vmatpush.bf16.msrb.mxu3 %v3100_v9  ;;  %1915 = vmatpush.bf16.msrb.mxu2 %v3116_v6 }
  0xd6   :  { %1903 = vmatpush.bf16.msrb.mxu1 %v3107_v39  ;;  %v1358_v49 = vpop.f32.mrf.mxu3 }
  0xd7   :  { %v1369_v43 = vpop.f32.mrf.mxu2 }
  0xd8   :  { %1890 = vmatpush.bf16.msrb.mxu3 %v3099_v53  ;;  %v1370_v2 = vadd.f32 %v1369_v43, %v1357_v62  ;;  %1916 = vmatpush.bf16.msrb.mxu2 %v3115_v13  ;;  %v3125_v53 = vld [vmem:[%s3416_s3 + $0xf8] sm:$0xff] }
  0xd9   :  { %2768 = vmatmul.msk.bf16.vlgmr.msra.gmra.mxu1 %vm1252_vm0, %v3253_v48  ;;  %v3104_v48 = vld [vmem:[%s3416_s3 + $0x50] sm:$0xff]  ;;  %1927 = vmatpush.bf16.msrb.mxu0 %v3125_v53 }
  0xda   :  { %1904 = vmatpush.bf16.msrb.mxu1 %v3106_v40  ;;  %v3121_v40 = vld [vmem:[%s3416_s3 + $0xd8] sm:$0xff] }
  0xdc   :  { %1891 = vmatpush.bf16.msrb.mxu3 %v3098_v34  ;;  %1917 = vmatpush.bf16.msrb.mxu2 %v3114_v15 }
  0xdd   :  { %1928 = vmatpush.bf16.msrb.mxu0 %v3124_v32 }
  0xde   :  { %1905 = vmatpush.bf16.msrb.mxu1 %v3105_v45  ;;  %v3120_v45 = vld [vmem:[%s3416_s3 + $0xd0] sm:$0xff] }
  0xdf   :  { %v1371_v51 = vpop.f32.mrf.mxu2 }
  0xe0   :  { %1892 = vmatpush.bf16.msrb.mxu3 %v3097_v36  ;;  %1918 = vmatpush.bf16.msrb.mxu2 %v3113_v57 }
  0xe1   :  { %1929 = vmatpush.bf16.msrb.mxu0 %v3123_v29 }
  0xe2   :  { %1906 = vmatpush.bf16.msrb.mxu1 %v3104_v48 }
  0xe4   :  { %1893 = vmatpush.bf16.msrb.mxu3 %v3096_v41  ;;  %1919 = vmatpush.bf16.msrb.mxu2 %v3112_v21 }
  0xe5   :  { %1930 = vmatpush.bf16.msrb.mxu0 %v3122_v35 }
  0xe6   :  { %1907 = vmatpush.bf16.msrb.mxu1 %v3103_v54  ;;  %v1382_v58 = vpop.f32.mrf.mxu0  ;;  %v1395_v61 = vpop.f32.mrf.mxu1 }
  0xe7   :  { %v1383_v4 = vadd.f32 %v1382_v58, %v1370_v2 }
  0xe8   :  { %1894 = vmatpush.bf16.msrb.mxu3 %v3095_v46  ;;  %1920 = vmatpush.bf16.msrb.mxu2 %v3111_v25 }
  0xe9   :  { %v1396_v8 = vadd.f32 %v1395_v61, %v1383_v4  ;;  %1931 = vmatpush.bf16.msrb.mxu0 %v3121_v40 }
  0xea   :  { %1908 = vmatpush.bf16.msrb.mxu1 %v3102_v56 }
  0xec   :  { %1895 = vmatpush.bf16.msrb.mxu3 %v3094_v50  ;;  %1921 = vmatpush.bf16.msrb.mxu2 %v3110_v20  ;;  %v3119_v50 = vld [vmem:[%s3416_s3 + $0xc8] sm:$0xff] }
  0xed   :  { %1932 = vmatpush.bf16.msrb.mxu0 %v3120_v45 }
  0xee   :  { %v1408_v63 = vpop.f32.mrf.mxu3  ;;  %v1384_v0 = vpop.f32.mrf.mxu0 }
  0xef   :  { %1896 = vmatmul.bf16.vlgmr.msrb.gmra.mxu3 %v1624_v55  ;;  %v1397_v3 = vpop.f32.mrf.mxu1  ;;  %v1409_v12 = vadd.f32 %v1408_v63, %v1396_v8  ;;  %v3118_v55 = vld [vmem:[%s3416_s3 + $0xc0] sm:$0xff] }
  0xf1   :  { %1933 = vmatpush.bf16.msrb.mxu0 %v3119_v50 }
  0xf2   :  { %v1421_v1 = vpop.f32.mrf.mxu2 }
  0xf3   :  { %v1422_v14 = vadd.f32 %v1421_v1, %v1409_v12 }
  0xf5   :  { %1934 = vmatpush.bf16.msrb.mxu0 %v3118_v55 }
  0xf6   :  { %v1410_v7 = vpop.f32.mrf.mxu3 }
  0xfa   :  { %v1423_v11 = vpop.f32.mrf.mxu2 }
  0xfe   :  { %v1434_v16 = vpop.f32.mrf.mxu3 }
  0xff   :  { %v1435_v17 = vadd.f32 %v1434_v16, %v1422_v14 }
 0x101   :  { %v1621_v18 = vmax.f32 %v1435_v17, 0.0 }
 0x103   :  { %v1625_v19 = vpack.c.bf16 %v1621_v18, %v1621_v18 }
 0x105   :  { %1909 = vmatmul.bf16.vlgmr.msrb.gmra.mxu1 %v1625_v19  ;;  %v3138_v19 = vld [vmem:[%s3417_s4] ss:$0 sm:$0xff]  ;;  %s3198_s4 = smov [#allocation5]  }
 0x106   :  { %v1436_v22 = vpop.f32.mrf.mxu3  ;;  %v1473_v23 = vpop.f32.mrf.mxu0  ;;  %s1969_s16 = sshll.u32 %s3198_s4, 4  ;;  %s1970_s16 = int_to_ptr.vmem [resolvable:$true] %s1969_s16 }
 0x107   :  { %v1447_v24 = vpop.f32.mrf.mxu1 }
 0x108   :  { %v1448_v34 = vadd.f32 %v1447_v24, %v242_v33 }
 0x10e   :  { %v1475_v27 = vpop.f32.mrf.mxu0 }
 0x10f   :  { %v1449_v9 = vpop.f32.mrf.mxu1 }
 0x112   :  { %v1460_v26 = vpop.f32.mrf.mxu3  ;;  %v1486_v28 = vpop.f32.mrf.mxu2 }
 0x113   :  { %v1461_v36 = vadd.f32 %v1460_v26, %v1448_v34 }
 0x115   :  { %v1474_v38 = vadd.f32 %v1473_v23, %v1461_v36 }
 0x116   :  { %v1525_v31 = vpop.f32.mrf.mxu0 }
 0x117   :  { %v1487_v42 = vadd.f32 %v1486_v28, %v1474_v38 }
 0x11a   :  { %v1462_v30 = vpop.f32.mrf.mxu3  ;;  %v1488_v60 = vpop.f32.mrf.mxu2 }
 0x11e   :  { %v1527_v39 = vpop.f32.mrf.mxu0 }
 0x126   :  { %v1499_v37 = vpop.f32.mrf.mxu1 }
 0x127   :  { %v1500_v43 = vadd.f32 %v1499_v37, %v1487_v42 }
 0x12a   :  { %v1551_v41 = vpop.f32.mrf.mxu0 }
 0x12e   :  { %v1501_v44 = vpop.f32.mrf.mxu1 }
 0x132   :  { %v1512_v46 = vpop.f32.mrf.mxu3  ;;  %v1538_v47 = vpop.f32.mrf.mxu2 }
 0x133   :  { %v1513_v48 = vadd.f32 %v1512_v46, %v1500_v43  ;;  %v1553_v52 = vpop.f32.mrf.mxu0  ;;  %v1539_v61 = vadd.f32 %v1538_v47, %v243_v59 }
 0x135   :  { %v1526_v49 = vadd.f32 %v1525_v31, %v1513_v48  ;;  %v1552_v63 = vadd.f32 %v1551_v41, %v1539_v61 }
 0x137   :  { %v1622_v51 = vmax.f32 %v1526_v49, 0.0 }
 0x139   :  { %v1626_v54 = vpack.c.bf16 %v1622_v51, %v1622_v51 }
 0x13a   :  { %v1514_v56 = vpop.f32.mrf.mxu3  ;;  %v1540_v58 = vpop.f32.mrf.mxu2 }
 0x13b   :  { %1922 = vmatmul.bf16.vlgmr.msrb.gmra.mxu2 %v1626_v54 }
 0x146   :  { %v1564_v62 = vpop.f32.mrf.mxu1 }
 0x147   :  { %v1565_v1 = vadd.f32 %v1564_v62, %v1552_v63 }
 0x14a   :  { %v1603_v0 = vpop.f32.mrf.mxu0 }
 0x14e   :  { %v1566_v2 = vpop.f32.mrf.mxu1 }
 0x152   :  { %v1577_v3 = vpop.f32.mrf.mxu3  ;;  %v1590_v5 = vpop.f32.mrf.mxu2 }
 0x153   :  { %v1578_v4 = vadd.f32 %v1577_v3, %v1565_v1  ;;  %v1605_v7 = vpop.f32.mrf.mxu0 }
 0x155   :  { %v1591_v6 = vadd.f32 %v1590_v5, %v1578_v4 }
 0x156   :  { %v1616_v11 = vpop.f32.mrf.mxu1 }
 0x157   :  { %v1604_v8 = vadd.f32 %v1603_v0, %v1591_v6 }
 0x159   :  { %v1617_v12 = vadd.f32 %v1616_v11, %v1604_v8 }
 0x15a   :  { %v1579_v13 = vpop.f32.mrf.mxu3  ;;  %v1592_v14 = vpop.f32.mrf.mxu2 }
 0x15b   :  { %v1623_v15 = vmax.f32 %v1617_v12, 0.0 }
 0x15d   :  { %v1627_v16 = vpack.c.bf16 %v1623_v15, %v1623_v15 }
 0x15e   :  { %v1618_v10 = vpop.f32.mrf.mxu1 }
 0x15f   :  { %1935 = vmatmul.bf16.vlgmr.msrb.gmra.mxu0 %v1627_v16 }
 0x172   :  { %v1897_v17 = vpop.f32.mrf.mxu3 }
 0x173   :  { %v1898_v57 = vadd.f32 %v3138_v19, %v1897_v17 }
 0x17a   :  { %v1899_v18 = vpop.f32.mrf.mxu3 }
 0x182   :  { %v1910_v21 = vpop.f32.mrf.mxu1 }
 0x183   :  { %v1911_v22 = vadd.f32 %v1910_v21, %v1898_v57 }
 0x18a   :  { %v1912_v23 = vpop.f32.mrf.mxu1 }
 0x1be   :  { %v1923_v24 = vpop.f32.mrf.mxu2 }
 0x1bf   :  { %v1924_v26 = vadd.f32 %v1923_v24, %v1911_v22 }
 0x1c6   :  { %v1925_v25 = vpop.f32.mrf.mxu2 }
 0x1dc   :  { %v1936_v27 = vpop.f32.mrf.mxu0 }
 0x1dd   :  { %v1937_v28 = vadd.f32 %v1936_v27, %v1924_v26 }
 0x1df   :  { %v2897_v9 = vmul.f32 -1.442695, %v1937_v28 }
 0x1e1   :  { %3139 = vpow2.f32 %v2897_v9 }
 0x1e4   :  { %v1938_v20 = vpop.f32.mrf.mxu0 }
 0x1e7   :  { %v3140_v53 = vpop.eup %3139 }
 0x1e8   :  { %v1943_v30 = vadd.f32 1.0, %v3140_v53 }
 0x1ea   :  { %3141 = vrcp.f32 %v1943_v30  ;;  %v1955_v60 = vand.u32 2147483648, %v1943_v30  ;;  %v1953_v39 = vand.u32 2147483647, %v1943_v30  ;;  %vm1949_vm2 = vweird.f32 %v1943_v30 }
 0x1ec   :  { %v1956_v36 = vor.u32 1.1754944e-38, %v1955_v60  ;;  %vm1954_vm4 = vcmp.eq.f32.partialorder %v1953_v39, 8.507059e+37 }
 0x1f0   :  { %v3142_v31 = vpop.eup %3141 }
 0x1f1   :  { %v1945_v32 = vmul.f32 %v3142_v31, %v1943_v30  ;;  %vm1950_vm1 = vweird.f32 %v3142_v31 }
 0x1f2   :  { %vm1951_vm3 = vmor %vm1949_vm2, %vm1950_vm1 }
 0x1f3   :  { %v1946_v33 = vsub.f32 1.0, %v1945_v32 }
 0x1f5   :  { %v1947_v34 = vmul.f32 %v3142_v31, %v1946_v33 }
 0x1f7   :  { %v1948_v29 = vadd.f32 %v3142_v31, %v1947_v34 }
 0x1f9   :  { %v1952_v35 = vsel %vm1951_vm3, %v3142_v31, %v1948_v29 }
 0x1fa   :  { %v1957_v37 = vsel %vm1954_vm4, %v1956_v36, %v1952_v35 }
 0x1fb   :  { %v1959_v38 = vmul.f32 10000.0, %v1957_v37 }
 0x1fd   :  { %v3128_v40 = vcvt.f32.s32 %v1959_v38  ;;  %v3126_v41 = vand.u32 2147483647, %v1959_v38  ;;  %v3131_v44 = vand.u32 2147483648, %v1959_v38 }
 0x1ff   :  { %v3129_v42 = vcvt.s32.f32 %v3128_v40  ;;  %vm3127_vm5 = vcmp.lt.f32.partialorder %v3126_v41, 8388608.0 }
 0x201   :  { %v3130_v43 = vand.u32 2147483647, %v3129_v42 }
 0x203   :  { %v3132_v45 = vor.u32 %v3131_v44, %v3130_v43 }
 0x205   :  { %v3133_v46 = vsel %vm3127_vm5, %v3132_v45, %v1959_v38 }
 0x206   :  { %v1961_v48 = vmul.f32 0.0001, %v3133_v46 }
 0x208   :  { %1963 = vst.msk [vmem:[#allocation5] sm:$0xff] %vm1962_vm6, %v1961_v48 }
 0x209   :  { %1974 = dma.vmem_to_hbm [thread:$0]  %s1970_s16, 128, %s1972_s19, [#allocation4]  }
 0x20a   :  { %3193 = dma.done.wait [#allocation4], 128  }
 0x20b   :  { %3194 = vsyncadd [#allocation4], 4294967168 }
 0x20c   :  { %1979 = vsyncpa [#allocation3], 1 }
 0x20d   :  { %1980 = vsyncpa [#allocation4], 1 }

</bundles_post_ra>
